<compile_context>
chip_gen: v5e
topology: v5e:2x2
jax: 0.10.0
libtpu: 0.0.40
codegen_flags: <defaults>
</compile_context>

<pallas_src>
import functools

import jax
import jax.numpy as jnp
import numpy as np
from jax.experimental import pallas as pl
from jax.experimental.pallas import tpu as pltpu

BN_EPS = 1e-5


# --------------------------- Pallas kernel ----------------------------------
def secat_resblock_kernel(x_ref, zext_ref, pmask_ref, wk_ref, b_ref,
                          w1h_ref, w2_ref, out_ref, *, H, W):
    Wp = W + 2
    HWp = H * Wp
    bB, Rpad, Cin = x_ref.shape
    Cout = out_ref.shape[-1]

    xf = x_ref[...]                                   # (bB, Rpad, Cin) bf16
    x2d = xf.reshape(bB * Rpad, Cin)                  # layout-free: Rpad % 8 == 0

    # 3x3 conv (BN pre-folded): ONE wide MXU matmul against all 9 taps at once
    # (N = 9*Cout), then shift-accumulate the nine Cout-wide column blocks.
    # The per-tap (dy, dx) shift is a static slice of the f32 product; width-
    # padding garbage lands in output columns w >= W, discarded by the wrapper.
    p = jnp.dot(x2d, wk_ref[...],
                preferred_element_type=jnp.float32)   # (bB*Rpad, 9*Cout)
    p = p.reshape(bB, Rpad, 9 * Cout)                 # layout-free split of M

    acc = jnp.zeros((bB, HWp, Cout), jnp.float32)
    for dy in range(3):
        for dx in range(3):
            t = 3 * dy + dx
            off = dy * Wp + dx
            acc = acc + p[:, off:off + HWp, t * Cout:(t + 1) * Cout]
    h = jnp.maximum(acc + b_ref[0:1, :], 0.0)         # (bB, HWp, Cout)

    # SECat gate: block-diagonal masked global mean of h (padding columns
    # zeroed, 1/(H*W) folded into the mask) plus the precomputed extractor
    # branch, then the tiny 2-layer MLP — all batched over the bB samples.
    h_pool = jnp.dot(pmask_ref[...], h.reshape(bB * HWp, Cout),
                     preferred_element_type=jnp.float32)          # (bB, Cout)
    z = jnp.maximum(
        jnp.dot(h_pool, w1h_ref[...], preferred_element_type=jnp.float32)
        + zext_ref[0], 0.0)                                       # (bB, hidden)
    gate = jax.nn.sigmoid(
        jnp.dot(z, w2_ref[...], preferred_element_type=jnp.float32)
        + b_ref[1:2, :])                                          # (bB, Cout)

    # Residual: x lives at padded offset (1, 1) inside the same input slab.
    # Slice first, then cast (no dead-row f32 temporaries).
    resid = xf[:, Wp + 1: Wp + 1 + HWp, :].astype(jnp.float32)
    out_ref[...] = (h * gate[:, None, :] + resid).astype(out_ref.dtype)


# --------------------------- glue / wrapper ----------------------------------
def _round_up(n, m):
    return ((n + m - 1) // m) * m


def secat_resblock(x_nchw, ext_nchw, params, *, batch_block=None):
    B, C, H, W = x_nchw.shape
    Cin = Cout = C                     # residual add requires in_ch == out_ch
    hidden = Cout // 16
    Hp, Wp = H + 2, W + 2
    HWp = H * Wp
    # Rows needed by the largest tap shift (off_max = 2*Wp + 2) + sublane align.
    Rpad = _round_up(max(Hp * Wp, HWp + 2 * Wp + 2), 8)
    assert Rpad >= HWp + 2 * Wp + 2 and Rpad >= Hp * Wp

    # Samples stacked per grid step (amortizes per-step overhead + MXU fill).
    if batch_block is None:
        batch_block = 2 if B % 2 == 0 else 1
    bB = max(1, min(batch_block, B))
    Bp = _round_up(B, bB)

    x = jnp.transpose(x_nchw, (0, 2, 3, 1)).astype(jnp.float32)    # NHWC
    e = jnp.transpose(ext_nchw, (0, 2, 3, 1)).astype(jnp.float32)

    # Zero-padded input, flattened over (H+2)*(W+2), extra zero rows for the
    # tap shifts + sublane alignment, zero-padded batch, cast to bf16.
    xpad = jnp.pad(x, ((0, Bp - B), (1, 1), (1, 1), (0, 0)))
    xpad = xpad.reshape(Bp, Hp * Wp, Cin)
    xpad = jnp.pad(xpad, ((0, 0), (0, Rpad - Hp * Wp), (0, 0))).astype(jnp.bfloat16)

    # Fold BatchNorm (inference / running stats) into the conv weight / bias,
    # and concatenate the 9 taps along the output axis: (Cin, 9*Cout).
    scale = params["bn_gamma"] * jax.lax.rsqrt(params["bn_var"] + BN_EPS)   # (Cout,)
    w_f = params["w_conv"] * scale[:, None, None, None]                     # (Cout,Cin,3,3)
    wk = jnp.transpose(w_f, (2, 3, 1, 0)).reshape(9, Cin, Cout)             # tap-major
    wk_cat = jnp.transpose(wk, (1, 0, 2)).reshape(Cin, 9 * Cout).astype(jnp.bfloat16)
    b_fold = (params["b_conv"] - params["bn_mean"]) * scale + params["bn_beta"]
    biases = jnp.stack([b_fold, params["b2"]], axis=0).astype(jnp.float32)  # (2, Cout)

    # Extractor branch of the SE MLP only needs a global mean -> do it in XLA
    # (the extractor tensor itself is never streamed into VMEM).
    e_pool = e.mean(axis=(1, 2))                                            # (B, Cout)
    w1 = params["w1"]                                                       # (hidden, 2C)
    z_ext = (e_pool @ w1[:, Cout:].T).astype(jnp.float32)                   # (B, hidden)
    z_ext = jnp.pad(z_ext, ((0, Bp - B), (0, 0))).reshape(Bp // bB, bB, hidden)
    w1h = jnp.asarray(w1[:, :Cout].T, jnp.float32)                          # (Cout, hidden)
    w2 = jnp.asarray(params["w2"].T, jnp.float32)                           # (hidden, Cout)

    # Block-diagonal mean-over-valid-pixels mask (zeros on the padded-width
    # garbage columns, 1/(H*W) divisor folded in): (bB, bB*HWp).
    col = jnp.arange(HWp) % Wp
    row_mask = jnp.where(col < W, 1.0 / (H * W), 0.0).astype(jnp.float32)   # (HWp,)
    pool_mask = (jnp.eye(bB, dtype=jnp.float32)[:, :, None]
                 * row_mask[None, None, :]).reshape(bB, bB * HWp)

    kernel = functools.partial(secat_resblock_kernel, H=H, W=W)

    out_flat = pl.pallas_call(
        kernel,
        out_shape=jax.ShapeDtypeStruct((Bp, HWp, Cout), x_nchw.dtype),
        grid_spec=pltpu.PrefetchScalarGridSpec(
            num_scalar_prefetch=0,
            grid=(Bp // bB,),
            in_specs=[
                pl.BlockSpec((bB, Rpad, Cin), lambda b: (b, 0, 0)),      # padded x (bf16)
                pl.BlockSpec((1, bB, hidden), lambda b: (b, 0, 0)),      # extractor branch
                pl.BlockSpec((bB, bB * HWp), lambda b: (0, 0)),          # block-diag pool mask
                pl.BlockSpec((Cin, 9 * Cout), lambda b: (0, 0)),         # folded conv W (bf16)
                pl.BlockSpec((2, Cout), lambda b: (0, 0)),               # [folded bias, SE b2]
                pl.BlockSpec((Cout, hidden), lambda b: (0, 0)),          # SE linear-1 (h half)
                pl.BlockSpec((hidden, Cout), lambda b: (0, 0)),          # SE linear-2
            ],
            out_specs=pl.BlockSpec((bB, HWp, Cout), lambda b: (b, 0, 0)),
        ),
        compiler_params=pltpu.CompilerParams(
            dimension_semantics=("parallel",)),       # batch-blocks across v7x TCs
    )(xpad, z_ext, pool_mask, wk_cat, biases, w1h, w2)

    out = out_flat[:B].reshape(B, H, Wp, Cout)[:, :, :W, :]   # drop padded-width cols
    return jnp.transpose(out, (0, 3, 1, 2))                   # NCHW


# --------------------------- pure-JAX reference ------------------------------
def secat_resblock_reference(x_nchw, ext_nchw, p):
    x = jnp.transpose(x_nchw, (0, 2, 3, 1))
    e = jnp.transpose(ext_nchw, (0, 2, 3, 1))
    w_hwio = jnp.transpose(p["w_conv"], (2, 3, 1, 0))
    conv = jax.lax.conv_general_dilated(
        x, w_hwio, (1, 1), "SAME",
        dimension_numbers=("NHWC", "HWIO", "NHWC")) + p["b_conv"]
    h = (conv - p["bn_mean"]) * (p["bn_gamma"] / jnp.sqrt(p["bn_var"] + BN_EPS)) \
        + p["bn_beta"]
    h = jnp.maximum(h, 0.0)
    hp = h.mean(axis=(1, 2))
    ep = e.mean(axis=(1, 2))
    cat = jnp.concatenate([hp, ep], axis=1)
    z = jnp.maximum(cat @ p["w1"].T, 0.0)
    s = jax.nn.sigmoid(z @ p["w2"].T + p["b2"])
    out = h * s[:, None, None, :] + x
    return jnp.transpose(out, (0, 3, 1, 2))


# --------------------------- parameter init ----------------------------------
def init_params(key, C):
    hidden = C // 16
    ks = jax.random.split(key, 8)
    return {
        "w_conv": 0.1 * jax.random.normal(ks[0], (C, C, 3, 3), jnp.float32),
        "b_conv": 0.1 * jax.random.normal(ks[1], (C,), jnp.float32),
        "bn_gamma": 1.0 + 0.1 * jax.random.normal(ks[2], (C,), jnp.float32),
        "bn_beta": 0.1 * jax.random.normal(ks[3], (C,), jnp.float32),
        "bn_mean": 0.1 * jax.random.normal(ks[4], (C,), jnp.float32),
        "bn_var": 0.5 + jnp.abs(jax.random.normal(ks[5], (C,), jnp.float32)),
        "w1": 0.2 * jax.random.normal(ks[6], (hidden, 2 * C), jnp.float32),
        "w2": 0.2 * jax.random.normal(ks[7], (C, hidden), jnp.float32),
        "b2": jnp.zeros((C,), jnp.float32),
    }


if __name__ == "__main__":
    B, C, H, W = 2, 32, 8, 8          # in_ch == out_ch (residual), hidden = 2
    key = jax.random.PRNGKey(0)
    kx, ke, kp = jax.random.split(key, 3)
    x = jax.random.normal(kx, (B, C, H, W), jnp.float32)
    extractor = jax.random.normal(ke, (B, C, H, W), jnp.float32)
    params = init_params(kp, C)

    out = jax.block_until_ready(secat_resblock(x, extractor, params))
    ref = jax.block_until_ready(secat_resblock_reference(x, extractor, params))

    assert out.shape == (B, C, H, W)
    # bf16 MXU operands (f32 accumulation) vs a pure-f32 reference.
    np.testing.assert_allclose(np.asarray(out), np.asarray(ref),
                               rtol=5e-2, atol=8e-2)
    print("KERNEL_OK")
</pallas_src>

<mosaic_0001>
module attributes {stable_mosaic.version = 11 : i64} {
  func.func @secat_resblock_kernel(%arg0: i32, %arg1: memref<2x104x32xbf16, #tpu.memory_space<vmem>>, %arg2: memref<1x2x2xf32, #tpu.memory_space<vmem>>, %arg3: memref<2x160xf32, #tpu.memory_space<vmem>>, %arg4: memref<32x288xbf16, #tpu.memory_space<vmem>>, %arg5: memref<2x32xf32, #tpu.memory_space<vmem>>, %arg6: memref<32x2xf32, #tpu.memory_space<vmem>>, %arg7: memref<2x32xf32, #tpu.memory_space<vmem>>, %arg8: memref<2x80x32xf32, #tpu.memory_space<vmem>>) attributes {dimension_semantics = [#tpu.dimension_semantics<parallel>], iteration_bounds = array<i64: 1>, scalar_prefetch = 0 : i64, scratch_operands = 0 : i64, tpu.core_type = #tpu.core_type<tc>, window_params = [{transform_indices = @transform_0, window_bounds = array<i64: 2, 104, 32>}, {transform_indices = @transform_1, window_bounds = array<i64: 1, 2, 2>}, {pipeline_mode = #tpu.pipeline_mode<synchronous>, transform_indices = @transform_2, window_bounds = array<i64: 2, 160>}, {pipeline_mode = #tpu.pipeline_mode<synchronous>, transform_indices = @transform_3, window_bounds = array<i64: 32, 288>}, {pipeline_mode = #tpu.pipeline_mode<synchronous>, transform_indices = @transform_4, window_bounds = array<i64: 2, 32>}, {pipeline_mode = #tpu.pipeline_mode<synchronous>, transform_indices = @transform_5, window_bounds = array<i64: 32, 2>}, {pipeline_mode = #tpu.pipeline_mode<synchronous>, transform_indices = @transform_6, window_bounds = array<i64: 2, 32>}, {transform_indices = @transform_7, window_bounds = array<i64: 2, 80, 32>}]} {
    %c0 = arith.constant 0 : index
    %c0_0 = arith.constant 0 : index
    %c0_1 = arith.constant 0 : index
    %0 = vector.load %arg1[%c0, %c0_0, %c0_1] : memref<2x104x32xbf16, #tpu.memory_space<vmem>>, vector<2x104x32xbf16>
    %1 = vector.shape_cast %0 : vector<2x104x32xbf16> to vector<208x32xbf16>
    %c0_2 = arith.constant 0 : index
    %c0_3 = arith.constant 0 : index
    %2 = vector.load %arg4[%c0_2, %c0_3] : memref<32x288xbf16, #tpu.memory_space<vmem>>, vector<32x288xbf16>
    %cst = arith.constant dense<0.000000e+00> : vector<208x288xf32>
    %3 = tpu.matmul %1, %2, %cst {dimension_numbers = #tpu.dot_dimension_numbers<[1], [0], [0], [1], [0, 0, 1, 1], [], []>} : vector<208x32xbf16>, vector<32x288xbf16>, vector<208x288xf32> -> vector<208x288xf32>
    %4 = vector.shape_cast %3 : vector<208x288xf32> to vector<2x104x288xf32>
    %cst_4 = arith.constant 0.000000e+00 : f32
    %5 = vector.broadcast %cst_4 : f32 to vector<2x80x32xf32>
    %6 = vector.extract_strided_slice %4 {offsets = [0, 0, 0], sizes = [2, 80, 32], strides = [1, 1, 1]} : vector<2x104x288xf32> to vector<2x80x32xf32>
    %7 = arith.addf %5, %6 : vector<2x80x32xf32>
    %8 = vector.extract_strided_slice %4 {offsets = [0, 1, 32], sizes = [2, 80, 32], strides = [1, 1, 1]} : vector<2x104x288xf32> to vector<2x80x32xf32>
    %9 = arith.addf %7, %8 : vector<2x80x32xf32>
    %10 = vector.extract_strided_slice %4 {offsets = [0, 2, 64], sizes = [2, 80, 32], strides = [1, 1, 1]} : vector<2x104x288xf32> to vector<2x80x32xf32>
    %11 = arith.addf %9, %10 : vector<2x80x32xf32>
    %12 = vector.extract_strided_slice %4 {offsets = [0, 10, 96], sizes = [2, 80, 32], strides = [1, 1, 1]} : vector<2x104x288xf32> to vector<2x80x32xf32>
    %13 = arith.addf %11, %12 : vector<2x80x32xf32>
    %14 = vector.extract_strided_slice %4 {offsets = [0, 11, 128], sizes = [2, 80, 32], strides = [1, 1, 1]} : vector<2x104x288xf32> to vector<2x80x32xf32>
    %15 = arith.addf %13, %14 : vector<2x80x32xf32>
    %16 = vector.extract_strided_slice %4 {offsets = [0, 12, 160], sizes = [2, 80, 32], strides = [1, 1, 1]} : vector<2x104x288xf32> to vector<2x80x32xf32>
    %17 = arith.addf %15, %16 : vector<2x80x32xf32>
    %18 = vector.extract_strided_slice %4 {offsets = [0, 20, 192], sizes = [2, 80, 32], strides = [1, 1, 1]} : vector<2x104x288xf32> to vector<2x80x32xf32>
    %19 = arith.addf %17, %18 : vector<2x80x32xf32>
    %20 = vector.extract_strided_slice %4 {offsets = [0, 21, 224], sizes = [2, 80, 32], strides = [1, 1, 1]} : vector<2x104x288xf32> to vector<2x80x32xf32>
    %21 = arith.addf %19, %20 : vector<2x80x32xf32>
    %22 = vector.extract_strided_slice %4 {offsets = [0, 22, 256], sizes = [2, 80, 32], strides = [1, 1, 1]} : vector<2x104x288xf32> to vector<2x80x32xf32>
    %23 = arith.addf %21, %22 : vector<2x80x32xf32>
    %c0_5 = arith.constant 0 : index
    %c0_6 = arith.constant 0 : index
    %24 = vector.load %arg5[%c0_5, %c0_6] : memref<2x32xf32, #tpu.memory_space<vmem>>, vector<1x32xf32>
    %25 = vector.shape_cast %24 : vector<1x32xf32> to vector<1x1x32xf32>
    %26 = vector.broadcast %25 : vector<1x1x32xf32> to vector<2x80x32xf32>
    %27 = arith.addf %23, %26 : vector<2x80x32xf32>
    %cst_7 = arith.constant 0.000000e+00 : f32
    %28 = vector.broadcast %cst_7 : f32 to vector<2x80x32xf32>
    %29 = arith.maximumf %27, %28 : vector<2x80x32xf32>
    %c0_8 = arith.constant 0 : index
    %c0_9 = arith.constant 0 : index
    %30 = vector.load %arg3[%c0_8, %c0_9] : memref<2x160xf32, #tpu.memory_space<vmem>>, vector<2x160xf32>
    %31 = vector.shape_cast %29 : vector<2x80x32xf32> to vector<160x32xf32>
    %cst_10 = arith.constant dense<0.000000e+00> : vector<2x32xf32>
    %32 = tpu.matmul %30, %31, %cst_10 {dimension_numbers = #tpu.dot_dimension_numbers<[1], [0], [0], [1], [0, 0, 1, 1], [], []>} : vector<2x160xf32>, vector<160x32xf32>, vector<2x32xf32> -> vector<2x32xf32>
    %c0_11 = arith.constant 0 : index
    %c0_12 = arith.constant 0 : index
    %33 = vector.load %arg6[%c0_11, %c0_12] : memref<32x2xf32, #tpu.memory_space<vmem>>, vector<32x2xf32>
    %cst_13 = arith.constant dense<0.000000e+00> : vector<2x2xf32>
    %34 = tpu.matmul %32, %33, %cst_13 {dimension_numbers = #tpu.dot_dimension_numbers<[1], [0], [0], [1], [0, 0, 1, 1], [], []>} : vector<2x32xf32>, vector<32x2xf32>, vector<2x2xf32> -> vector<2x2xf32>
    %c0_14 = arith.constant 0 : index
    %c0_15 = arith.constant 0 : index
    %c0_16 = arith.constant 0 : index
    %35 = vector.load %arg2[%c0_14, %c0_15, %c0_16] : memref<1x2x2xf32, #tpu.memory_space<vmem>>, vector<1x2x2xf32>
    %36 = vector.shape_cast %35 : vector<1x2x2xf32> to vector<2x2xf32>
    %37 = arith.addf %34, %36 : vector<2x2xf32>
    %cst_17 = arith.constant 0.000000e+00 : f32
    %38 = vector.broadcast %cst_17 : f32 to vector<2x2xf32>
    %39 = arith.maximumf %37, %38 : vector<2x2xf32>
    %c0_18 = arith.constant 0 : index
    %c0_19 = arith.constant 0 : index
    %40 = vector.load %arg7[%c0_18, %c0_19] : memref<2x32xf32, #tpu.memory_space<vmem>>, vector<2x32xf32>
    %cst_20 = arith.constant dense<0.000000e+00> : vector<2x32xf32>
    %41 = tpu.matmul %39, %40, %cst_20 {dimension_numbers = #tpu.dot_dimension_numbers<[1], [0], [0], [1], [0, 0, 1, 1], [], []>} : vector<2x2xf32>, vector<2x32xf32>, vector<2x32xf32> -> vector<2x32xf32>
    %c1 = arith.constant 1 : index
    %c0_21 = arith.constant 0 : index
    %42 = vector.load %arg5[%c1, %c0_21] : memref<2x32xf32, #tpu.memory_space<vmem>>, vector<1x32xf32>
    %43 = vector.broadcast %42 : vector<1x32xf32> to vector<2x32xf32>
    %44 = arith.addf %41, %43 : vector<2x32xf32>
    %45 = arith.negf %44 : vector<2x32xf32>
    %46 = math.exp %45 : vector<2x32xf32>
    %cst_22 = arith.constant 1.000000e+00 : f32
    %47 = vector.broadcast %cst_22 : f32 to vector<2x32xf32>
    %48 = arith.addf %47, %46 : vector<2x32xf32>
    %49 = arith.divf %47, %48 : vector<2x32xf32>
    %50 = vector.extract_strided_slice %0 {offsets = [0, 11, 0], sizes = [2, 80, 32], strides = [1, 1, 1]} : vector<2x104x32xbf16> to vector<2x80x32xbf16>
    %51 = arith.extf %50 : vector<2x80x32xbf16> to vector<2x80x32xf32>
    %52 = vector.shape_cast %49 : vector<2x32xf32> to vector<2x1x32xf32>
    %53 = vector.broadcast %52 : vector<2x1x32xf32> to vector<2x80x32xf32>
    %54 = arith.mulf %29, %53 : vector<2x80x32xf32>
    %55 = arith.addf %54, %51 : vector<2x80x32xf32>
    %c0_23 = arith.constant 0 : index
    %c0_24 = arith.constant 0 : index
    %c0_25 = arith.constant 0 : index
    %56 = vector.load %arg8[%c0_23, %c0_24, %c0_25] : memref<2x80x32xf32, #tpu.memory_space<vmem>>, vector<2x80x32xf32>
    tpu.vector_store %arg8[%c0_23, %c0_24, %c0_25], %55 {strides = array<i32>} : memref<2x80x32xf32, #tpu.memory_space<vmem>>, vector<2x80x32xf32>,
    return
  }
  func.func @transform_0(%arg0: i32) -> (i32, i32, i32) {
    %c0_i32 = arith.constant 0 : i32
    %c0_i32_0 = arith.constant 0 : i32
    %c0_i32_1 = arith.constant 0 : i32
    return %arg0, %c0_i32, %c0_i32_0 : i32, i32, i32
  }
  func.func @transform_1(%arg0: i32) -> (i32, i32, i32) {
    %c0_i32 = arith.constant 0 : i32
    %c0_i32_0 = arith.constant 0 : i32
    %c0_i32_1 = arith.constant 0 : i32
    return %arg0, %c0_i32, %c0_i32_0 : i32, i32, i32
  }
  func.func @transform_2(%arg0: i32) -> (i32, i32) {
    %c0_i32 = arith.constant 0 : i32
    %c0_i32_0 = arith.constant 0 : i32
    %c0_i32_1 = arith.constant 0 : i32
    return %c0_i32, %c0_i32_0 : i32, i32
  }
  func.func @transform_3(%arg0: i32) -> (i32, i32) {
    %c0_i32 = arith.constant 0 : i32
    %c0_i32_0 = arith.constant 0 : i32
    %c0_i32_1 = arith.constant 0 : i32
    return %c0_i32, %c0_i32_0 : i32, i32
  }
  func.func @transform_4(%arg0: i32) -> (i32, i32) {
    %c0_i32 = arith.constant 0 : i32
    %c0_i32_0 = arith.constant 0 : i32
    %c0_i32_1 = arith.constant 0 : i32
    return %c0_i32, %c0_i32_0 : i32, i32
  }
  func.func @transform_5(%arg0: i32) -> (i32, i32) {
    %c0_i32 = arith.constant 0 : i32
    %c0_i32_0 = arith.constant 0 : i32
    %c0_i32_1 = arith.constant 0 : i32
    return %c0_i32, %c0_i32_0 : i32, i32
  }
  func.func @transform_6(%arg0: i32) -> (i32, i32) {
    %c0_i32 = arith.constant 0 : i32
    %c0_i32_0 = arith.constant 0 : i32
    %c0_i32_1 = arith.constant 0 : i32
    return %c0_i32, %c0_i32_0 : i32, i32
  }
  func.func @transform_7(%arg0: i32) -> (i32, i32, i32) {
    %c0_i32 = arith.constant 0 : i32
    %c0_i32_0 = arith.constant 0 : i32
    %c0_i32_1 = arith.constant 0 : i32
    return %arg0, %c0_i32, %c0_i32_0 : i32, i32, i32
  }
}

</mosaic_0001>

<bundles_post_ra>
// kernel: tpu_custom_call.1
= control target key start
LH: loop header
LB: loop body
LE: loop exit
PB: predicated region body
PF: predicated region fallthrough
CT: control target
= control target key end

     0   :  { %vm158_vm0 = vcmask 261120   ;;  %vm577_vm1 = vcmask 1045504   ;;  %vm454_vm2 = vcmask 1046528   ;;  %s1826_s23 = smov 64   ;;  %s1827_s24 = smov 96   ;;  %vm808_vm3 = vcmask 1044480   ;;  %s3192_s3 = inlined_call_operand.vmem [shape: bf16[32,288], index: 3, kind: input, shape index: {}]   ;;  %s3193_s0 = inlined_call_operand.vmem [shape: bf16[2,104,32], index: 0, kind: input, shape index: {}]   ;;  %s3194_s4 = inlined_call_operand.vmem [shape: f32[2,32], index: 4, kind: input, shape index: {}]   ;;  %s3195_s2 = inlined_call_operand.vmem [shape: f32[2,160], index: 2, kind: input, shape index: {}]   ;;  %s3196_s5 = inlined_call_operand.vmem [shape: f32[32,2], index: 5, kind: input, shape index: {}]   ;;  %s3197_s6 = inlined_call_operand.vmem [shape: f32[2,32], index: 6, kind: input, shape index: {}]   ;;  %s3198_s1 = inlined_call_operand.vmem [shape: f32[1,2,2], index: 1, kind: input, shape index: {}]   ;;  %s3199_s7 = inlined_call_operand.vmem [shape: f32[2,80,32], index: 7, kind: output, shape index: {}]  }
   0x1   :  { %v1738_v0 = vld [vmem:[%s3192_s3 + $0x18] sm:$0xf]  ;;  %v1809_v1 = vld [vmem:[%s3192_s3 + $0x20] sm:$0xf0]  ;;  %v1808_v2 = vld [vmem:[%s3192_s3 + $0x1c] sm:$0xf] }
   0x2   :  { %v1739_v3 = vor.u32 %v1809_v1, %v1738_v0  ;;  %v1740_v4 = vld [vmem:[%s3192_s3 + $0x24] sm:$0xf0]  ;;  %v1726_v5 = vld [vmem:[%s3192_s3] sm:$0xf]  ;;  %v1806_v6 = vld [vmem:[%s3192_s3 + $0x8] sm:$0xf0] }
   0x3   :  { %v1743_v7 = vor.u32 %v1808_v2, %v1740_v4  ;;  %v1805_v8 = vld [vmem:[%s3192_s3 + $0x4] sm:$0xf]  ;;  %v1728_v9 = vld [vmem:[%s3192_s3 + $0xc] sm:$0xf0]  ;;  %v1727_v10 = vor.u32 %v1806_v6, %v1726_v5  ;;  %v1803_v13 = vld [vmem:[%s3193_s0 + $0x58] sm:$0xff]  ;;  %s1828_s27 = smov 32  }
   0x4   :  { %204 = vmatpush.bf16.msra.mxu0 %v1739_v3  ;;  %1811 = vmatpush.bf16.msra.mxu3 %v1739_v3  ;;  %v1731_v11 = vor.u32 %v1805_v8, %v1728_v9  ;;  %v1792_v12 = vld [vmem:[%s3193_s0] sm:$0xff]  ;;  %v1793_v14 = vld [vmem:[%s3193_s0 + $0x8] sm:$0xff]  ;;  %v1794_v16 = vld [vmem:[%s3193_s0 + $0x10] sm:$0xff]  ;;  %vm1100_vm4 = vcmask 1042432   ;;  %vm891_vm5 = vcmask 1043456   ;;  %vm1245_vm6 = vcmask 1041408  }
   0x5   :  { %276 = vmatpush.bf16.msra.mxu1 %v1743_v7  ;;  %v1804_v15 = vld [vmem:[%s3193_s0 + $0x60] sm:$0xff]  ;;  %v1920_v17 = vld [vmem:[%s3193_s0 + $0x18] sm:$0xff]  ;;  %v1939_v19 = vld [vmem:[%s3193_s0 + $0x28] sm:$0xff]  ;;  %vm1450_vm7 = vcmask 15360  }
   0x6   :  { %v1930_v18 = vld [vmem:[%s3193_s0 + $0x20] sm:$0xff]  ;;  %v1948_v20 = vld [vmem:[%s3193_s0 + $0x30] sm:$0xff]  ;;  %v1810_v22 = vld [vmem:[%s3192_s3 + $0x28] sm:$0xf0] }
   0x7   :  { %v1746_v21 = vld [vmem:[%s3192_s3 + $0x20] sm:$0xf]  ;;  %v1734_v24 = vld [vmem:[%s3192_s3 + $0x8] sm:$0xf]  ;;  %v1807_v25 = vld [vmem:[%s3192_s3 + $0x10] sm:$0xf0] }
   0x8   :  { %205 = vmatpush.bf16.msra.mxu0 %v1727_v10  ;;  %1812 = vmatpush.bf16.msra.mxu3 %v1727_v10  ;;  %v1747_v23 = vor.u32 %v1810_v22, %v1746_v21  ;;  %v1735_v26 = vor.u32 %v1807_v25, %v1734_v24  ;;  %v1971_v27 = vld [vmem:[%s3193_s0 + $0x38] sm:$0xff]  ;;  %v1982_v28 = vld [vmem:[%s3193_s0 + $0x40] sm:$0xff]  ;;  %v2007_v43 = vld [vmem:[%s3193_s0 + $0x48] sm:$0xff] }
   0x9   :  { %277 = vmatpush.bf16.msra.mxu1 %v1731_v11  ;;  %v2059_v4 = vld [vmem:[%s3193_s0 + $0x50] sm:$0xff] }
   0xa   :  { %348 = vmatpush.bf16.msra.mxu2 %v1747_v23 }
   0xb   :  { %1748 = vmatmul.msk.bf16.vlgmr.msra.gmra.mxu0 %vm158_vm0, %v1792_v12  ;;  %1759 = vmatmul.msk.bf16.vlgmr.msra.gmra.mxu3 %vm158_vm0, %v1803_v13 }
   0xc   :  { %1813 = vmatpush.bf16.msrb.mxu3 %v1743_v7  ;;  %1761 = vmatmul.msk.bf16.vlgmr.msra.gmra.mxu1 %vm158_vm0, %v1792_v12 }
   0xe   :  { %349 = vmatpush.bf16.msra.mxu2 %v1735_v26 }
  0x10   :  { %1814 = vmatpush.bf16.msrb.mxu3 %v1731_v11 }
  0x11   :  { %1774 = vmatmul.msk.bf16.vlgmr.msra.gmra.mxu2 %vm158_vm0, %v1792_v12 }
  0x14   :  { %1815 = vmatpush.bf16.msra.mxu3 %v1747_v23 }
  0x18   :  { %1816 = vmatpush.bf16.msra.mxu3 %v1735_v26 }
  0x1b   :  { %1749 = vmatmul.msk.bf16.gmra.mxu0 %vm158_vm0, %v1793_v14  ;;  %1760 = vmatmul.msk.bf16.gmra.mxu3 %vm158_vm0, %v1804_v15 }
  0x1c   :  { %1762 = vmatmul.msk.bf16.gmra.mxu1 %vm158_vm0, %v1793_v14 }
  0x21   :  { %1775 = vmatmul.msk.bf16.gmra.mxu2 %vm158_vm0, %v1793_v14 }
  0x2b   :  { %1750 = vmatmul.msk.bf16.gmra.mxu0 %vm158_vm0, %v1794_v16  ;;  %1772 = vmatmul.msk.bf16.vlgmr.msrb.gmra.mxu3 %vm158_vm0, %v1803_v13 }
  0x2c   :  { %1763 = vmatmul.msk.bf16.gmra.mxu1 %vm158_vm0, %v1794_v16 }
  0x31   :  { %1776 = vmatmul.msk.bf16.gmra.mxu2 %vm158_vm0, %v1794_v16 }
  0x3b   :  { %1751 = vmatmul.msk.bf16.gmra.mxu0 %vm158_vm0, %v1920_v17  ;;  %1773 = vmatmul.msk.bf16.gmra.mxu3 %vm158_vm0, %v1804_v15 }
  0x3c   :  { %1764 = vmatmul.msk.bf16.gmra.mxu1 %vm158_vm0, %v1920_v17 }
  0x41   :  { %1777 = vmatmul.msk.bf16.gmra.mxu2 %vm158_vm0, %v1920_v17 }
  0x4b   :  { %1752 = vmatmul.msk.bf16.gmra.mxu0 %vm158_vm0, %v1930_v18  ;;  %1785 = vmatmul.msk.bf16.vlgmr.msra.gmra.mxu3 %vm158_vm0, %v1803_v13 }
  0x4c   :  { %1765 = vmatmul.msk.bf16.gmra.mxu1 %vm158_vm0, %v1930_v18 }
  0x51   :  { %1778 = vmatmul.msk.bf16.gmra.mxu2 %vm158_vm0, %v1930_v18 }
  0x5b   :  { %1753 = vmatmul.msk.bf16.gmra.mxu0 %vm158_vm0, %v1939_v19  ;;  %1786 = vmatmul.msk.bf16.gmra.mxu3 %vm158_vm0, %v1804_v15 }
  0x5c   :  { %1766 = vmatmul.msk.bf16.gmra.mxu1 %vm158_vm0, %v1939_v19 }
  0x61   :  { %1779 = vmatmul.msk.bf16.gmra.mxu2 %vm158_vm0, %v1939_v19 }
  0x6b   :  { %1754 = vmatmul.msk.bf16.gmra.mxu0 %vm158_vm0, %v1948_v20 }
  0x6c   :  { %1767 = vmatmul.msk.bf16.gmra.mxu1 %vm158_vm0, %v1948_v20 }
  0x71   :  { %1780 = vmatmul.msk.bf16.gmra.mxu2 %vm158_vm0, %v1948_v20 }
  0x7b   :  { %1755 = vmatmul.msk.bf16.gmra.mxu0 %vm158_vm0, %v1971_v27 }
  0x7c   :  { %1768 = vmatmul.msk.bf16.gmra.mxu1 %vm158_vm0, %v1971_v27 }
  0x81   :  { %1781 = vmatmul.msk.bf16.gmra.mxu2 %vm158_vm0, %v1971_v27 }
  0x88   :  { %v1984_v29 = vpop.f32.mrf.mxu0 }
  0x89   :  { %v279_v30 = vpop.f32.mrf.mxu1  ;;  %v455_v33 = vrot.slane %v1984_v29, 1  ;;  %v578_v34 = vrot.slane %v1984_v29, 2 }
  0x8b   :  { %1756 = vmatmul.msk.bf16.gmra.mxu0 %vm158_vm0, %v1982_v28 }
  0x8c   :  { %1769 = vmatmul.msk.bf16.gmra.mxu1 %vm158_vm0, %v1982_v28 }
  0x8e   :  { %v1990_v31 = vpop.f32.mrf.mxu3 }
  0x8f   :  { %v3203_v41 = vrot.slane %v1990_v31, 2  ;;  %v3204_v49 = vrot.slane %v1990_v31, 1 }
  0x90   :  { %v1992_v32 = vpop.f32.mrf.mxu0 }
  0x91   :  { %v456_v35 = vrot.slane %v1992_v32, 1  ;;  %v579_v36 = vrot.slane %v1992_v32, 2  ;;  %v280_v37 = vpop.f32.mrf.mxu1  ;;  %1782 = vmatmul.msk.bf16.gmra.mxu2 %vm158_vm0, %v1982_v28 }
  0x92   :  { %v809_v44 = vrot.slane %v280_v37, 3  ;;  %v892_v5 = vrot.slane %v280_v37, 4 }
  0x93   :  { %v580_v38 = vsel %vm577_vm1, %v578_v34, %v579_v36  ;;  %v457_v39 = vsel %vm454_vm2, %v455_v33, %v456_v35 }
  0x94   :  { %620 = vrot.lane.b32.xlu1 %v580_v38, %s1826_s23  ;;  %497 = vrot.lane.b32.xlu0 %v457_v39, %s1827_s24 }
  0x96   :  { %v263_v40 = vpop.f32.mrf.mxu3 }
  0x97   :  { %v618_v42 = vrot.slane %v263_v40, 2  ;;  %v495_v45 = vrot.slane %v263_v40, 1 }
  0x98   :  { %v2009_v46 = vpop.f32.mrf.mxu0 }
  0x99   :  { %v2011_v47 = vpop.f32.mrf.mxu1  ;;  %v619_v48 = vsel %vm577_vm1, %v3203_v41, %v618_v42  ;;  %v496_v51 = vsel %vm454_vm2, %v3204_v49, %v495_v45  ;;  %v581_v53 = vrot.slane %v2009_v46, 2  ;;  %v458_v55 = vrot.slane %v2009_v46, 1 }
  0x9a   :  { %v810_v50 = vrot.slane %v2011_v47, 3  ;;  %742 = vrot.lane.b32.xlu2 %v619_v48, %s1828_s27  ;;  %v1101_v56 = vrot.slane %v2011_v47, 5  ;;  %v893_v6 = vrot.slane %v2011_v47, 4 }
  0x9b   :  { %1757 = vmatmul.msk.bf16.gmra.mxu0 %vm158_vm0, %v2007_v43  ;;  %v582_v59 = vsel %vm577_vm1, %v579_v36, %v581_v53  ;;  %v459_v62 = vsel %vm454_vm2, %v456_v35, %v458_v55 }
  0x9c   :  { %1770 = vmatmul.msk.bf16.gmra.mxu1 %vm158_vm0, %v2007_v43  ;;  %658 = vrot.lane.b32.xlu1 %v619_v48, %s1826_s23  ;;  %v2028_v52 = vsel %vm808_vm3, %v809_v44, %v810_v50  ;;  %v894_v12 = vsel %vm891_vm5, %v892_v5, %v893_v6 }
  0x9d   :  { %535 = vrot.lane.b32.xlu0 %v496_v51, %s1827_s24 }
  0x9e   :  { %v266_v54 = vpop.f32.mrf.mxu3 }
  0x9f   :  { %v704_v1 = vrot.slane %v266_v54, 2 }
  0xa0   :  { %v2034_v57 = vpop.f32.mrf.mxu0 }
  0xa1   :  { %v2036_v58 = vpop.f32.mrf.mxu1  ;;  %v583_v3 = vrot.slane %v2034_v57, 2  ;;  %v705_v9 = vsel %vm577_vm1, %v618_v42, %v704_v1  ;;  %v460_v16 = vrot.slane %v2034_v57, 1  ;;  %1783 = vmatmul.msk.bf16.gmra.mxu2 %vm158_vm0, %v2007_v43 }
  0xa2   :  { %v812_v60 = vrot.slane %v2036_v58, 3  ;;  %v1102_v61 = vrot.slane %v2036_v58, 5  ;;  %706 = vrot.lane.b32.xlu2 %v582_v59, %s1828_s27  ;;  %v895_v30 = vrot.slane %v2036_v58, 4 }
  0xa3   :  { %v584_v11 = vsel %vm577_vm1, %v581_v53, %v583_v3  ;;  %v461_v24 = vsel %vm454_vm2, %v458_v55, %v460_v16 }
  0xa4   :  { %622 = vrot.lane.b32.xlu1 %v582_v59, %s1826_s23  ;;  %v2047_v63 = vsel %vm808_vm3, %v810_v50, %v812_v60  ;;  %v2052_v0 = vsel %vm1100_vm4, %v1101_v56, %v1102_v61  ;;  %v896_v37 = vsel %vm891_vm5, %v893_v6, %v895_v30 }
  0xa5   :  { %499 = vrot.lane.b32.xlu0 %v459_v62, %s1827_s24 }
  0xa6   :  { %v268_v2 = vpop.f32.mrf.mxu3 }
  0xa8   :  { %v2062_v7 = vpop.f32.mrf.mxu0 }
  0xa9   :  { %v2064_v8 = vpop.f32.mrf.mxu1  ;;  %v585_v15 = vrot.slane %v2062_v7, 2  ;;  %v462_v2 = vrot.slane %v2062_v7, 1 }
  0xaa   :  { %v814_v10 = vrot.slane %v2064_v8, 3  ;;  %744 = vrot.lane.b32.xlu2 %v705_v9, %s1828_s27  ;;  %v897_v33 = vrot.slane %v2064_v8, 4  ;;  %v1104_v40 = vrot.slane %v2064_v8, 5 }
  0xab   :  { %1758 = vmatmul.msk.bf16.gmra.mxu0 %vm158_vm0, %v2059_v4  ;;  %v586_v23 = vsel %vm577_vm1, %v583_v3, %v585_v15  ;;  %v463_v9 = vsel %vm454_vm2, %v460_v16, %v462_v2 }
  0xac   :  { %1771 = vmatmul.msk.bf16.gmra.mxu1 %vm158_vm0, %v2059_v4  ;;  %624 = vrot.lane.b32.xlu1 %v584_v11, %s1826_s23  ;;  %v2077_v13 = vsel %vm808_vm3, %v812_v60, %v814_v10  ;;  %v898_v36 = vsel %vm891_vm5, %v895_v30, %v897_v33  ;;  %v1105_v59 = vsel %vm1100_vm4, %v1102_v61, %v1104_v40 }
  0xad   :  { %934 = vrot.lane.b32.xlu0 %v894_v12, %s1827_s24 }
  0xae   :  { %v2080_v14 = vpop.f32.mrf.mxu3 }
  0xaf   :  { %v3205_v45 = vrot.slane %v2080_v14, 3  ;;  %v3200_v53 = vrot.slane %v2080_v14, 5 }
  0xb0   :  { %v2084_v17 = vpop.f32.mrf.mxu0 }
  0xb1   :  { %v2086_v21 = vpop.f32.mrf.mxu1  ;;  %v587_v39 = vrot.slane %v2084_v17, 2  ;;  %1784 = vmatmul.msk.bf16.gmra.mxu2 %vm158_vm0, %v2059_v4 }
  0xb2   :  { %v816_v22 = vrot.slane %v2086_v21, 3  ;;  %708 = vrot.lane.b32.xlu2 %v584_v11, %s1828_s27  ;;  %v1106_v60 = vrot.slane %v2086_v21, 5  ;;  %v899_v12 = vrot.slane %v2086_v21, 4  ;;  %v464_v21 = vrot.slane %v2084_v17, 1 }
  0xb3   :  { %v588_v51 = vsel %vm577_vm1, %v585_v15, %v587_v39 }
  0xb4   :  { %626 = vrot.lane.b32.xlu1 %v586_v23, %s1826_s23  ;;  %v2096_v25 = vsel %vm808_vm3, %v814_v10, %v816_v22  ;;  %v1107_v6 = vsel %vm1100_vm4, %v1104_v40, %v1106_v60  ;;  %v900_v16 = vsel %vm891_vm5, %v897_v33, %v899_v12 }
  0xb5   :  { %501 = vrot.lane.b32.xlu0 %v461_v24, %s1827_s24 }
  0xb6   :  { %v2099_v26 = vpop.f32.mrf.mxu3 }
  0xb7   :  { %v847_v47 = vrot.slane %v2099_v26, 3  ;;  %v1137_v54 = vrot.slane %v2099_v26, 5  ;;  %v930_v33 = vrot.slane %v2099_v26, 4 }
  0xb8   :  { %v2103_v34 = vpop.f32.mrf.mxu0 }
  0xb9   :  { %v2105_v35 = vpop.f32.mrf.mxu1  ;;  %v2155_v19 = vsel %vm1100_vm4, %v3200_v53, %v1137_v54  ;;  %v2160_v61 = vsel %vm808_vm3, %v3205_v45, %v847_v47  ;;  %v589_v11 = vrot.slane %v2103_v34, 2 }
  0xba   :  { %v818_v18 = vrot.slane %v2105_v35, 3  ;;  %710 = vrot.lane.b32.xlu2 %v586_v23, %s1828_s27  ;;  %3226 = vst [vmem:[#allocation3_spill] sm:$0xff] %v2155_v19  ;;  %v1108_v24 = vrot.slane %v2105_v35, 5 }
  0xbb   :  { %3227 = vst [vmem:[#allocation4_spill] sm:$0xff] %v2160_v61  ;;  %v590_v23 = vsel %vm577_vm1, %v587_v39, %v589_v11  ;;  %v465_v39 = vsel %vm454_vm2, %v462_v2, %v464_v21 }
  0xbc   :  { %1022 = vrot.lane.b32.xlu1 %v898_v36, %s1826_s23  ;;  %v2113_v38 = vsel %vm808_vm3, %v816_v22, %v818_v18 }
  0xbd   :  { %936 = vrot.lane.b32.xlu0 %v896_v37, %s1827_s24 }
  0xbe   :  { %v2118_v42 = vpop.f32.mrf.mxu3 }
  0xbf   :  { %v849_v48 = vrot.slane %v2118_v42, 3  ;;  %v3202_v55 = vrot.slane %v2118_v42, 5  ;;  %v932_v20 = vrot.slane %v2118_v42, 4 }
  0xc0   :  { %v2120_v44 = vpop.f32.mrf.mxu0 }
  0xc1   :  { %v2125_v50 = vpop.f32.mrf.mxu1  ;;  %v2141_v62 = vsel %vm808_vm3, %v847_v47, %v849_v48  ;;  %v2150_v58 = vsel %vm1100_vm4, %v1137_v54, %v3202_v55  ;;  %v2204_v40 = vsel %vm891_vm5, %v930_v33, %v932_v20 }
  0xc2   :  { %v820_v56 = vrot.slane %v2125_v50, 3  ;;  %712 = vrot.lane.b32.xlu2 %v588_v51, %s1828_s27  ;;  %3225 = vst [vmem:[#allocation2_spill] sm:$0xff] %v2150_v58 }
  0xc4   :  { %1145 = vrot.lane.b32.xlu1 %v1105_v59, %s1828_s27  ;;  %v2145_v1 = vsel %vm808_vm3, %v818_v18, %v820_v56 }
  0xc5   :  { %1020 = vrot.lane.b32.xlu0 %v896_v37, %s1826_s23  ;;  %v1109_v37 = vsel %vm1100_vm4, %v1106_v60, %v1108_v24 }
  0xc8   :  { %v2163_v3 = vpop.f32.mrf.mxu0 }
  0xc9   :  { %v2165_v5 = vpop.f32.mrf.mxu1 }
  0xca   :  { %v822_v8 = vrot.slane %v2165_v5, 3  ;;  %1147 = vrot.lane.b32.xlu2 %v1107_v6, %s1828_s27 }
  0xcc   :  { %628 = vrot.lane.b32.xlu1 %v588_v51, %s1826_s23  ;;  %v2173_v10 = vsel %vm808_vm3, %v820_v56, %v822_v8  ;;  %v591_v51 = vrot.slane %v2120_v44, 2 }
  0xcd   :  { %503 = vrot.lane.b32.xlu0 %v463_v9, %s1827_s24 }
  0xce   :  { %v592_v27 = vsel %vm577_vm1, %v589_v11, %v591_v51 }
  0xd0   :  { %v2178_v15 = vpop.f32.mrf.mxu0 }
  0xd1   :  { %v2180_v22 = vpop.f32.mrf.mxu1 }
  0xd2   :  { %714 = vrot.lane.b32.xlu2 %v590_v23, %s1828_s27  ;;  %v3206_v54 = vrot.slane %v2180_v22, 4  ;;  %v824_v60 = vrot.slane %v2180_v22, 3 }
  0xd4   :  { %1024 = vrot.lane.b32.xlu1 %v900_v16, %s1826_s23  ;;  %v2244_v11 = vsel %vm808_vm3, %v822_v8, %v824_v60  ;;  %v2258_v8 = vpop.f32.mrf.mxu3 }
  0xd5   :  { %938 = vrot.lane.b32.xlu0 %v898_v36, %s1827_s24  ;;  %v901_v36 = vrot.slane %v2105_v35, 4  ;;  %v3201_v35 = vrot.slane %v2080_v14, 4 }
  0xd7   :  { %v902_v26 = vsel %vm891_vm5, %v899_v12, %v901_v36  ;;  %v2230_v9 = vsel %vm891_vm5, %v3201_v35, %v930_v33  ;;  %v466_v33 = vrot.slane %v2103_v34, 1 }
  0xd8   :  { %v2191_v30 = vpop.f32.mrf.mxu0 }
  0xd9   :  { %v2193_v18 = vpop.f32.mrf.mxu1 }
  0xda   :  { %1149 = vrot.lane.b32.xlu2 %v1109_v37, %s1828_s27  ;;  %v3208_v56 = vrot.slane %v2193_v18, 4  ;;  %v3207_v2 = vrot.slane %v2193_v18, 3  ;;  %v903_v37 = vrot.slane %v2125_v50, 4 }
  0xdc   :  { %630 = vrot.lane.b32.xlu1 %v590_v23, %s1826_s23  ;;  %v2238_v12 = vsel %vm891_vm5, %v3206_v54, %v3208_v56  ;;  %v1110_v23 = vrot.slane %v2125_v50, 5  ;;  %v593_v50 = vrot.slane %v2163_v3, 2 }
  0xdd   :  { %505 = vrot.lane.b32.xlu0 %v465_v39, %s1827_s24 }
  0xe0   :  { %v2206_v47 = vpop.f32.mrf.mxu0 }
  0xe1   :  { %v2208_v48 = vpop.f32.mrf.mxu1 }
  0xe2   :  { %972 = vrot.lane.b32.xlu2 %v2204_v40, %s1827_s24  ;;  %v1118_v43 = vrot.slane %v2208_v48, 5  ;;  %v828_v45 = vrot.slane %v2208_v48, 3 }
  0xe4   :  { %1026 = vrot.lane.b32.xlu1 %v902_v26, %s1826_s23 }
  0xe5   :  { %940 = vrot.lane.b32.xlu0 %v900_v16, %s1827_s24  ;;  %v2249_v16 = vsel %vm808_vm3, %v824_v60, %v3207_v2  ;;  %v467_v60 = vsel %vm454_vm2, %v464_v21, %v466_v33  ;;  %v1112_v21 = vrot.slane %v2165_v5, 5 }
  0xe7   :  { %v1113_v41 = vsel %vm1100_vm4, %v1110_v23, %v1112_v21 }
  0xe8   :  { %v237_v59 = vpop.f32.mrf.mxu0 }
  0xe9   :  { %v2223_v6 = vpop.f32.mrf.mxu1  ;;  %v1111_v59 = vsel %vm1100_vm4, %v1108_v24, %v1110_v23  ;;  %v351_v24 = vpop.f32.mrf.mxu2 }
  0xea   :  { %716 = vrot.lane.b32.xlu2 %v592_v27, %s1828_s27 }
  0xec   :  { %632 = vrot.lane.b32.xlu1 %v592_v27, %s1826_s23  ;;  %v904_v27 = vsel %vm891_vm5, %v901_v36, %v903_v37  ;;  %v594_v36 = vsel %vm577_vm1, %v591_v51, %v593_v50 }
  0xed   :  { %970 = vrot.lane.b32.xlu0 %v2230_v9, %s1827_s24 }
  0xf1   :  { %v310_v39 = vpop.f32.mrf.mxu1  ;;  %v352_v55 = vpop.f32.mrf.mxu2 }
  0xf2   :  { %1151 = vrot.lane.b32.xlu2 %v1111_v59, %s1828_s27  ;;  %v1018_v39 = vrot.slane %v2258_v8, 4 }
  0xf4   :  { %v2260_v53 = vpop.permute.xlu2 %742  ;;  %1028 = vrot.lane.b32.xlu1 %v904_v27, %s1826_s23  ;;  %v1019_v28 = vsel %vm891_vm5, %v932_v20, %v1018_v39  ;;  %v595_v39 = vrot.slane %v2178_v15, 2 }
  0xf5   :  { %3228 = vst [vmem:[#allocation5_spill] sm:$0xff] %v2260_v53  ;;  %507 = vrot.lane.b32.xlu0 %v467_v60, %s1827_s24  ;;  %v468_v60 = vrot.slane %v2120_v44, 1 }
  0xf6   :  { %v596_v2 = vsel %vm577_vm1, %v593_v50, %v595_v39 }
  0xf7   :  { %v469_v51 = vsel %vm454_vm2, %v466_v33, %v468_v60  ;;  %v1016_v33 = vrot.slane %v2223_v6, 4 }
  0xf9   :  { %v2267_v59 = vpop.f32.mrf.mxu1  ;;  %v2288_v49 = vpop.f32.mrf.mxu2 }
  0xfa   :  { %718 = vrot.lane.b32.xlu2 %v594_v36, %s1828_s27 }
  0xfc   :  { %v707_v35 = vpop.permute.xlu2 %706  ;;  %1058 = vrot.lane.b32.xlu1 %v1019_v28, %s1826_s23  ;;  %v905_v28 = vrot.slane %v2165_v5, 4  ;;  %v1116_v5 = vrot.slane %v2193_v18, 5 }
  0xfd   :  { %942 = vrot.lane.b32.xlu0 %v902_v26, %s1827_s24 }
  0xfe   :  { %v2303_v61 = vsel %vm1100_vm4, %v1116_v5, %v1118_v43 }
 0x101   :  { %v2276_v24 = vpop.f32.mrf.mxu1  ;;  %v2324_v19 = vpop.f32.mrf.mxu2 }
 0x102   :  { %1153 = vrot.lane.b32.xlu2 %v1113_v41, %s1828_s27  ;;  %v911_v41 = vrot.slane %v2208_v48, 4  ;;  %v3229_v48 = vrot.slane %v2193_v18, 4 }
 0x104   :  { %v745_v20 = vpop.permute.xlu2 %744  ;;  %634 = vrot.lane.b32.xlu1 %v594_v36, %s1826_s23  ;;  %v1120_v36 = vrot.slane %v2223_v6, 5  ;;  %v2308_v6 = vsel %vm891_vm5, %v3229_v48, %v911_v41 }
 0x105   :  { %509 = vrot.lane.b32.xlu0 %v469_v51, %s1827_s24 }
 0x106   :  { %v621_v55 = vpop.permute.xlu1 %620  ;;  %v498_v26 = vpop.permute.xlu0 %497  ;;  %v2311_v50 = vsel %vm1100_vm4, %v1118_v43, %v1120_v36  ;;  %v470_v43 = vrot.slane %v2163_v3, 1 }
 0x107   :  { %v557_v23 = vadd.f32 %v498_v26, %v1984_v29  ;;  %v906_v29 = vsel %vm891_vm5, %v903_v37, %v905_v28  ;;  %v1114_v37 = vrot.slane %v2180_v22, 5 }
 0x109   :  { %v680_v54 = vadd.f32 %v621_v55, %v557_v23  ;;  %v2295_v51 = vpop.f32.mrf.mxu1  ;;  %v2314_v55 = vsel %vm891_vm5, %v911_v41, %v1016_v33  ;;  %v1115_v36 = vsel %vm1100_vm4, %v1112_v21, %v1114_v37  ;;  %v3209_v21 = vrot.slane %v2324_v19, 6 }
 0x10a   :  { %720 = vrot.lane.b32.xlu2 %v596_v2, %s1828_s27 }
 0x10b   :  { %v766_v26 = vadd.f32 %v707_v35, %v680_v54  ;;  %v3230_v54 = vrot.slane %v2193_v18, 3 }
 0x10c   :  { %v709_v56 = vpop.permute.xlu2 %708  ;;  %1030 = vrot.lane.b32.xlu1 %v906_v29, %s1826_s23 }
 0x10d   :  { %944 = vrot.lane.b32.xlu0 %v904_v27, %s1827_s24  ;;  %v871_v35 = vadd.f32 %v2028_v52, %v766_v26  ;;  %v2322_v23 = vsel %vm808_vm3, %v3230_v54, %v828_v45  ;;  %v471_v45 = vsel %vm454_vm2, %v468_v60, %v470_v43  ;;  %v597_v26 = vrot.slane %v2191_v30, 2 }
 0x10e   :  { %v659_v53 = vpop.permute.xlu1 %658 }
 0x10f   :  { %v536_v48 = vpop.permute.xlu0 %535 }
 0x110   :  { %v576_v41 = vadd.f32 %v536_v48, %v1990_v31 }
 0x111   :  { %v2328_v33 = vpop.f32.mrf.mxu1 }
 0x112   :  { %v699_v27 = vadd.f32 %v659_v53, %v576_v41  ;;  %1155 = vrot.lane.b32.xlu2 %v1115_v36, %s1828_s27  ;;  %v359_v41 = vpop.f32.mrf.mxu2 }
 0x113   :  { %v1249_v36 = vrot.slane %v359_v41, 6  ;;  %v472_v41 = vrot.slane %v2178_v15, 1 }
 0x114   :  { %v711_v52 = vpop.permute.xlu2 %710  ;;  %636 = vrot.lane.b32.xlu1 %v596_v2, %s1826_s23  ;;  %v785_v18 = vadd.f32 %v745_v20, %v699_v27  ;;  %v598_v2 = vsel %vm577_vm1, %v595_v39, %v597_v26  ;;  %v3231_v27 = vrot.slane %v2180_v22, 4 }
 0x115   :  { %511 = vrot.lane.b32.xlu0 %v471_v45, %s1827_s24  ;;  %v1250_v45 = vsel %vm1245_vm6, %v3209_v21, %v1249_v36  ;;  %v473_v21 = vsel %vm454_vm2, %v470_v43, %v472_v41 }
 0x116   :  { %v623_v54 = vpop.permute.xlu1 %622  ;;  %v2339_v48 = vadd.f32 %v2141_v62, %v785_v18  ;;  %v908_v62 = vsel %vm891_vm5, %v905_v28, %v3231_v27  ;;  %v1117_v28 = vsel %vm1100_vm4, %v1114_v37, %v1116_v5  ;;  %v830_v5 = vrot.slane %v2267_v59, 3 }
 0x117   :  { %v500_v53 = vpop.permute.xlu0 %499  ;;  %v831_v37 = vrot.slane %v2276_v24, 3 }
 0x118   :  { %v558_v4 = vadd.f32 %v500_v53, %v1992_v32 }
 0x119   :  { %v2343_v60 = vpop.f32.mrf.mxu1  ;;  %v2388_v58 = vsel %vm808_vm3, %v830_v5, %v831_v37 }
 0x11a   :  { %v681_v20 = vadd.f32 %v623_v54, %v558_v4  ;;  %722 = vrot.lane.b32.xlu2 %v598_v2, %s1828_s27 }
 0x11c   :  { %v2353_v18 = vpop.permute.xlu2 %712  ;;  %1032 = vrot.lane.b32.xlu1 %v908_v62, %s1826_s23  ;;  %v767_v32 = vadd.f32 %v709_v56, %v681_v20  ;;  %v702_v56 = vrot.slane %v2206_v47, 2  ;;  %v361_v47 = vpop.f32.mrf.mxu2 }
 0x11d   :  { %946 = vrot.lane.b32.xlu0 %v906_v29, %s1827_s24 }
 0x11e   :  { %v625_v53 = vpop.permute.xlu1 %624  ;;  %v872_v39 = vadd.f32 %v2047_v63, %v767_v32  ;;  %v2369_v63 = vpop.f32.mrf.mxu0  ;;  %v833_v32 = vrot.slane %v2295_v51, 3  ;;  %v703_v43 = vsel %vm577_vm1, %v597_v26, %v702_v56 }
 0x11f   :  { %v935_v54 = vpop.permute.xlu0 %934 }
 0x120   :  { %v994_v22 = vadd.f32 %v935_v54, %v871_v35  ;;  %v2391_v26 = vsel %vm808_vm3, %v831_v37, %v833_v32 }
 0x121   :  { %v2359_v4 = vpop.f32.mrf.mxu1  ;;  %3232 = vst [vmem:[#allocation6_spill] sm:$0xff] %v2391_v26 }
 0x122   :  { %1157 = vrot.lane.b32.xlu2 %v1117_v28, %s1828_s27 }
 0x124   :  { %v2363_v27 = vpop.permute.xlu2 %1147  ;;  %638 = vrot.lane.b32.xlu1 %v598_v2, %s1826_s23 }
 0x125   :  { %513 = vrot.lane.b32.xlu0 %v473_v21, %s1827_s24  ;;  %v1251_v21 = vrot.slane %v361_v47, 6 }
 0x126   :  { %v627_v29 = vpop.permute.xlu1 %626  ;;  %v2395_v47 = vpop.f32.mrf.mxu0 }
 0x127   :  { %v502_v35 = vpop.permute.xlu0 %501 }
 0x128   :  { %v559_v20 = vadd.f32 %v502_v35, %v2009_v46  ;;  %v2385_v35 = vsel %vm1245_vm6, %v1249_v36, %v1251_v21 }
 0x129   :  { %v2375_v54 = vpop.f32.mrf.mxu1 }
 0x12a   :  { %v682_v2 = vadd.f32 %v625_v53, %v559_v20  ;;  %724 = vrot.lane.b32.xlu2 %v703_v43, %s1828_s27  ;;  %v474_v43 = vrot.slane %v2191_v30, 1  ;;  %v3233_v30 = vrot.slane %v2080_v14, 3 }
 0x12c   :  { %v2379_v28 = vpop.permute.xlu2 %714  ;;  %1034 = vrot.lane.b32.xlu1 %v2238_v12, %s1826_s23  ;;  %v768_v46 = vadd.f32 %v711_v52, %v682_v2 }
 0x12d   :  { %948 = vrot.lane.b32.xlu0 %v908_v62, %s1827_s24 }
 0x12e   :  { %v1023_v53 = vpop.permute.xlu1 %1022  ;;  %v873_v56 = vadd.f32 %v2077_v13, %v768_v46  ;;  %v475_v13 = vsel %vm454_vm2, %v472_v41, %v474_v43  ;;  %v2421_v41 = vpop.f32.mrf.mxu0 }
 0x12f   :  { %v937_v20 = vpop.permute.xlu0 %936  ;;  %v364_v43 = vpop.f32.mrf.mxu2 }
 0x130   :  { %v995_v52 = vadd.f32 %v937_v20, %v872_v39  ;;  %v835_v20 = vrot.slane %v2328_v33, 3 }
 0x131   :  { %v2397_v2 = vpop.f32.mrf.mxu1 }
 0x132   :  { %v1081_v62 = vadd.f32 %v1023_v53, %v995_v52  ;;  %v3210_v36 = vrot.slane %v2397_v2, 3  ;;  %1159 = vrot.lane.b32.xlu2 %v2303_v61, %s1828_s27  ;;  %v3211_v52 = vrot.slane %v2343_v60, 3 }
 0x134   :  { %v2402_v5 = vpop.permute.xlu2 %1149  ;;  %1036 = vrot.lane.b32.xlu1 %v2308_v6, %s1826_s23  ;;  %v2413_v39 = vsel %vm808_vm3, %v3210_v36, %v3233_v30  ;;  %v1253_v30 = vrot.slane %v364_v43, 6  ;;  %v600_v36 = vrot.slane %v2395_v47, 2 }
 0x135   :  { %515 = vrot.lane.b32.xlu0 %v475_v13, %s1827_s24  ;;  %3234 = vst [vmem:[#allocation7_spill] sm:$0xff] %v2413_v39  ;;  %v602_v13 = vrot.slane %v2421_v41, 2 }
 0x136   :  { %v1146_v37 = vpop.permute.xlu1 %1145 }
 0x137   :  { %v1021_v46 = vpop.permute.xlu0 %1020  ;;  %v1204_v53 = vadd.f32 %v1146_v37, %v1081_v62  ;;  %v2443_v37 = vsel %vm808_vm3, %v835_v20, %v3211_v52  ;;  %v603_v43 = vsel %vm577_vm1, %v600_v36, %v602_v13 }
 0x138   :  { %v2415_v61 = vadd.f32 %v1021_v46, %v994_v22 }
 0x139   :  { %v2419_v26 = vadd.f32 %v1250_v45, %v1204_v53  ;;  %v2435_v45 = vsel %vm1245_vm6, %v1251_v21, %v1253_v30 }
 0x13a   :  { %3235 = vst [vmem:[#allocation8_spill] sm:$0xff] %v2415_v61  ;;  %1161 = vrot.lane.b32.xlu2 %v2311_v50, %s1828_s27  ;;  %v2438_v50 = vsel %vm808_vm3, %v833_v32, %v835_v20 }
 0x13b   :  { %3236 = vst [vmem:[#allocation9_spill] sm:$0xff] %v2419_v26  ;;  %v599_v26 = vrot.slane %v2369_v63, 2 }
 0x13c   :  { %v973_v62 = vpop.permute.xlu2 %972  ;;  %1038 = vrot.lane.b32.xlu1 %v2314_v55, %s1826_s23  ;;  %v476_v55 = vrot.slane %v2369_v63, 1 }
 0x13d   :  { %v2430_v22 = vadd.f32 %v973_v62, %v2339_v48  ;;  %950 = vrot.lane.b32.xlu0 %v2238_v12, %s1827_s24  ;;  %v477_v48 = vrot.slane %v2395_v47, 1 }
 0x13e   :  { %v629_v46 = vpop.permute.xlu1 %628 }
 0x13f   :  { %v504_v53 = vpop.permute.xlu0 %503  ;;  %v478_v32 = vsel %vm454_vm2, %v476_v55, %v477_v48  ;;  %v601_v55 = vsel %vm577_vm1, %v599_v26, %v600_v36  ;;  %v913_v26 = vrot.slane %v2267_v59, 4  ;;  %v914_v36 = vrot.slane %v2276_v24, 4 }
 0x140   :  { %v560_v12 = vadd.f32 %v504_v53, %v2034_v57 }
 0x142   :  { %v683_v21 = vadd.f32 %v627_v29, %v560_v12  ;;  %642 = vrot.lane.b32.xlu2 %v603_v43, %s1826_s23  ;;  %v479_v29 = vrot.slane %v2421_v41, 1 }
 0x144   :  { %v2451_v62 = vpop.permute.xlu2 %716  ;;  %517 = vrot.lane.b32.xlu1 %v478_v32, %s1827_s24  ;;  %v769_v20 = vadd.f32 %v2353_v18, %v683_v21  ;;  %v2462_v32 = vpop.f32.mrf.mxu0 }
 0x145   :  { %952 = vrot.lane.b32.xlu0 %v2308_v6, %s1827_s24  ;;  %v3212_v6 = vrot.slane %v2462_v32, 2 }
 0x146   :  { %v1025_v52 = vpop.permute.xlu1 %1024  ;;  %v874_v39 = vadd.f32 %v2096_v25, %v769_v20  ;;  %v480_v25 = vsel %vm454_vm2, %v477_v48, %v479_v29 }
 0x147   :  { %v939_v57 = vpop.permute.xlu0 %938  ;;  %v605_v20 = vsel %vm577_vm1, %v602_v13, %v3212_v6 }
 0x148   :  { %v996_v53 = vadd.f32 %v939_v57, %v873_v56  ;;  %v366_v57 = vpop.f32.mrf.mxu2 }
 0x14a   :  { %v1082_v12 = vadd.f32 %v1025_v52, %v996_v53  ;;  %726 = vrot.lane.b32.xlu2 %v603_v43, %s1828_s27  ;;  %v1255_v53 = vrot.slane %v366_v57, 6 }
 0x14c   :  { %v1205_v18 = vadd.f32 %v2363_v27, %v1082_v12  ;;  %v2465_v21 = vpop.permute.xlu2 %1151  ;;  %640 = vrot.lane.b32.xlu1 %v601_v55, %s1826_s23  ;;  %v1122_v55 = vrot.slane %v2276_v24, 5  ;;  %v2490_v13 = vsel %vm1245_vm6, %v1253_v30, %v1255_v53  ;;  %v839_v24 = vrot.slane %v2359_v4, 3 }
 0x14d   :  { %519 = vrot.lane.b32.xlu0 %v480_v25, %s1827_s24  ;;  %v916_v25 = vrot.slane %v2295_v51, 4 }
 0x14e   :  { %v2472_v56 = vadd.f32 %v2385_v35, %v1205_v18  ;;  %v631_v52 = vpop.permute.xlu1 %630  ;;  %v915_v35 = vsel %vm891_vm5, %v913_v26, %v914_v36  ;;  %v481_v26 = vrot.slane %v2462_v32, 1 }
 0x14f   :  { %v506_v43 = vpop.permute.xlu0 %505  ;;  %v917_v30 = vsel %vm891_vm5, %v914_v36, %v916_v25 }
 0x150   :  { %3237 = vst [vmem:[#allocation10_spill] sm:$0xff] %v2472_v56  ;;  %v561_v27 = vadd.f32 %v506_v43, %v2062_v7  ;;  %v1123_v7 = vrot.slane %v2295_v51, 5 }
 0x152   :  { %v684_v48 = vadd.f32 %v629_v46, %v561_v27  ;;  %728 = vrot.lane.b32.xlu2 %v605_v20, %s1828_s27 }
 0x154   :  { %v2481_v12 = vpop.permute.xlu2 %718  ;;  %644 = vrot.lane.b32.xlu1 %v605_v20, %s1826_s23  ;;  %v770_v59 = vadd.f32 %v2379_v28, %v684_v48  ;;  %v1124_v28 = vsel %vm1100_vm4, %v1122_v55, %v1123_v7  ;;  %v2496_v20 = vpop.f32.mrf.mxu0  ;;  %v841_v48 = vrot.slane %v2375_v54, 3 }
 0x155   :  { %954 = vrot.lane.b32.xlu0 %v915_v35, %s1827_s24  ;;  %v1125_v35 = vrot.slane %v2328_v33, 5 }
 0x156   :  { %v1027_v46 = vpop.permute.xlu1 %1026  ;;  %v875_v18 = vadd.f32 %v2113_v38, %v770_v59 }
 0x157   :  { %v941_v43 = vpop.permute.xlu0 %940 }
 0x158   :  { %v997_v27 = vadd.f32 %v941_v43, %v874_v39  ;;  %v482_v39 = vsel %vm454_vm2, %v479_v29, %v481_v26  ;;  %v483_v43 = vrot.slane %v2496_v20, 1  ;;  %v1126_v29 = vsel %vm1100_vm4, %v1123_v7, %v1125_v35 }
 0x15a   :  { %v1083_v57 = vadd.f32 %v1027_v46, %v997_v27  ;;  %1163 = vrot.lane.b32.xlu2 %v1124_v28, %s1828_s27  ;;  %v3239_v46 = vrot.slane %v2343_v60, 3  ;;  %v1246_v28 = vrot.slane %v2288_v49, 6 }
 0x15c   :  { %v1206_v38 = vadd.f32 %v2402_v5, %v1083_v57  ;;  %v2503_v51 = vpop.permute.xlu2 %1153  ;;  %1040 = vrot.lane.b32.xlu1 %v917_v30, %s1826_s23  ;;  %v2515_v36 = vsel %vm808_vm3, %v3239_v46, %v839_v24  ;;  %v2518_v5 = vsel %vm808_vm3, %v839_v24, %v841_v48  ;;  %v484_v57 = vsel %vm454_vm2, %v481_v26, %v483_v43 }
 0x15d   :  { %521 = vrot.lane.b32.xlu0 %v482_v39, %s1827_s24  ;;  %v2527_v39 = vpop.f32.mrf.mxu0  ;;  %v606_v24 = vrot.slane %v2496_v20, 2 }
 0x15e   :  { %v2510_v59 = vadd.f32 %v2435_v45, %v1206_v38  ;;  %v633_v55 = vpop.permute.xlu1 %632  ;;  %v369_v45 = vpop.f32.mrf.mxu2  ;;  %v608_v6 = vrot.slane %v2527_v39, 2 }
 0x15f   :  { %v2521_v27 = vpop.permute.xlu0 %970  ;;  %v1257_v38 = vrot.slane %v369_v45, 6 }
 0x160   :  { %3238 = vst [vmem:[#allocation11_spill] sm:$0xff] %v2510_v59  ;;  %v3243_v59 = vrot.slane %v2462_v32, 2 }
 0x161   :  { %3240 = vst [vmem:[#allocation12_spill] sm:$0xff] %v2521_v27  ;;  %v2536_v49 = vsel %vm1245_vm6, %v1255_v53, %v1257_v38 }
 0x162   :  { %1165 = vrot.lane.b32.xlu2 %v1126_v29, %s1828_s27  ;;  %v3241_v29 = vrot.slane %v2324_v19, 6 }
 0x164   :  { %v2529_v46 = vpop.permute.xlu2 %720  ;;  %523 = vrot.lane.b32.xlu1 %v484_v57, %s1827_s24  ;;  %v2541_v26 = vsel %vm1245_vm6, %v1246_v28, %v3241_v29  ;;  %v609_v57 = vsel %vm577_vm1, %v606_v24, %v608_v6  ;;  %v918_v29 = vrot.slane %v2328_v33, 4 }
 0x165   :  { %956 = vrot.lane.b32.xlu0 %v917_v30, %s1827_s24  ;;  %3242 = vst [vmem:[#allocation13_spill] sm:$0xff] %v2541_v26  ;;  %v607_v30 = vsel %vm577_vm1, %v3243_v59, %v606_v24 }
 0x166   :  { %v1029_v7 = vpop.permute.xlu1 %1028  ;;  %v371_v59 = vpop.f32.mrf.mxu2  ;;  %v919_v24 = vsel %vm891_vm5, %v916_v25, %v918_v29 }
 0x167   :  { %v508_v45 = vpop.permute.xlu0 %507  ;;  %v1259_v61 = vrot.slane %v371_v59, 6 }
 0x168   :  { %v562_v27 = vadd.f32 %v508_v45, %v2084_v17 }
 0x169   :  { %v2568_v33 = vsel %vm1245_vm6, %v1257_v38, %v1259_v61 }
 0x16a   :  { %v685_v56 = vadd.f32 %v631_v52, %v562_v27  ;;  %648 = vrot.lane.b32.xlu2 %v609_v57, %s1826_s23 }
 0x16c   :  { %v2549_v53 = vpop.permute.xlu2 %1155  ;;  %646 = vrot.lane.b32.xlu1 %v607_v30, %s1826_s23  ;;  %v771_v19 = vadd.f32 %v2451_v62, %v685_v56 }
 0x16d   :  { %730 = vrot.lane.b32.xlu0 %v607_v30, %s1828_s27 }
 0x16e   :  { %v1059_v28 = vpop.permute.xlu1 %1058  ;;  %v876_v17 = vadd.f32 %v2145_v1, %v771_v19  ;;  %v1127_v1 = vrot.slane %v2343_v60, 5 }
 0x16f   :  { %v943_v52 = vpop.permute.xlu0 %942  ;;  %v2557_v27 = vadd.f32 %v1059_v28, %v2430_v22  ;;  %v3244_v22 = vrot.slane %v2397_v2, 3 }
 0x170   :  { %v998_v45 = vadd.f32 %v943_v52, %v875_v18  ;;  %v1128_v19 = vsel %vm1100_vm4, %v1125_v35, %v1127_v1 }
 0x171   :  { %v2573_v18 = vsel %vm808_vm3, %v841_v48, %v3244_v22  ;;  %v2584_v48 = vpop.f32.mrf.mxu0 }
 0x172   :  { %v1084_v26 = vadd.f32 %v1029_v7, %v998_v45  ;;  %732 = vrot.lane.b32.xlu2 %v609_v57, %s1828_s27  ;;  %v920_v7 = vrot.slane %v2343_v60, 4  ;;  %v485_v57 = vrot.slane %v2527_v39, 1  ;;  %v610_v45 = vrot.slane %v2584_v48, 2 }
 0x174   :  { %v1207_v62 = vadd.f32 %v2465_v21, %v1084_v26  ;;  %v2562_v56 = vpop.permute.xlu2 %722  ;;  %1042 = vrot.lane.b32.xlu1 %v919_v24, %s1826_s23  ;;  %v921_v28 = vsel %vm891_vm5, %v918_v29, %v920_v7  ;;  %v486_v60 = vsel %vm454_vm2, %v483_v43, %v485_v57  ;;  %v374_v29 = vpop.f32.mrf.mxu2 }
 0x175   :  { %958 = vrot.lane.b32.xlu0 %v919_v24, %s1827_s24  ;;  %v611_v24 = vsel %vm577_vm1, %v608_v6, %v610_v45  ;;  %v1261_v22 = vrot.slane %v374_v29, 6 }
 0x176   :  { %v2576_v25 = vadd.f32 %v2490_v13, %v1207_v62  ;;  %v635_v21 = vpop.permute.xlu1 %634 }
 0x177   :  { %v510_v26 = vpop.permute.xlu0 %509 }
 0x178   :  { %v563_v30 = vadd.f32 %v510_v26, %v2103_v34 }
 0x17a   :  { %v686_v38 = vadd.f32 %v633_v55, %v563_v30  ;;  %1167 = vrot.lane.b32.xlu2 %v1128_v19, %s1828_s27  ;;  %v922_v30 = vrot.slane %v2359_v4, 4 }
 0x17c   :  { %v2586_v52 = vpop.permute.xlu2 %1157  ;;  %1044 = vrot.lane.b32.xlu1 %v921_v28, %s1826_s23  ;;  %v772_v13 = vadd.f32 %v2481_v12, %v686_v38  ;;  %v1129_v12 = vrot.slane %v2359_v4, 5 }
 0x17d   :  { %525 = vrot.lane.b32.xlu0 %v486_v60, %s1827_s24  ;;  %v376_v60 = vpop.f32.mrf.mxu2 }
 0x17e   :  { %v1031_v34 = vpop.permute.xlu1 %1030  ;;  %v877_v35 = vadd.f32 %v2173_v10, %v772_v13  ;;  %v2603_v10 = vsel %vm1245_vm6, %v1259_v61, %v1261_v22  ;;  %v1130_v13 = vsel %vm1100_vm4, %v1127_v1, %v1129_v12  ;;  %v923_v61 = vsel %vm891_vm5, %v920_v7, %v922_v30 }
 0x17f   :  { %v945_v55 = vpop.permute.xlu0 %944 }
 0x180   :  { %v999_v59 = vadd.f32 %v945_v55, %v876_v17  ;;  %v2614_v55 = vpop.f32.mrf.mxu0 }
 0x181   :  { %v612_v1 = vrot.slane %v2614_v55, 2 }
 0x182   :  { %v1085_v62 = vadd.f32 %v1031_v34, %v999_v59  ;;  %734 = vrot.lane.b32.xlu2 %v611_v24, %s1828_s27 }
 0x184   :  { %v1208_v43 = vadd.f32 %v2503_v51, %v1085_v62  ;;  %v2597_v26 = vpop.permute.xlu2 %724  ;;  %650 = vrot.lane.b32.xlu1 %v611_v24, %s1826_s23  ;;  %v487_v51 = vrot.slane %v2584_v48, 1  ;;  %v924_v24 = vrot.slane %v2375_v54, 4 }
 0x185   :  { %960 = vrot.lane.b32.xlu0 %v921_v28, %s1827_s24  ;;  %v1263_v28 = vrot.slane %v376_v60, 6  ;;  %v1131_v60 = vrot.slane %v2375_v54, 5 }
 0x186   :  { %v2606_v17 = vadd.f32 %v2536_v49, %v1208_v43  ;;  %v637_v6 = vpop.permute.xlu1 %636  ;;  %v488_v4 = vsel %vm454_vm2, %v485_v57, %v487_v51  ;;  %v379_v43 = vpop.f32.mrf.mxu2  ;;  %v613_v57 = vsel %vm577_vm1, %v610_v45, %v612_v1 }
 0x187   :  { %v512_v19 = vpop.permute.xlu0 %511 }
 0x188   :  { %v564_v38 = vadd.f32 %v512_v19, %v2120_v44  ;;  %v2622_v44 = vsel %vm1245_vm6, %v1261_v22, %v1263_v28 }
 0x18a   :  { %v687_v34 = vadd.f32 %v635_v21, %v564_v38  ;;  %1169 = vrot.lane.b32.xlu2 %v1130_v13, %s1828_s27  ;;  %v1265_v38 = vrot.slane %v379_v43, 6 }
 0x18c   :  { %v2616_v49 = vpop.permute.xlu2 %1159  ;;  %962 = vrot.lane.b32.xlu1 %v923_v61, %s1827_s24  ;;  %v773_v59 = vadd.f32 %v2529_v46, %v687_v34  ;;  %v2643_v13 = vsel %vm1245_vm6, %v1263_v28, %v1265_v38 }
 0x18d   :  { %527 = vrot.lane.b32.xlu0 %v488_v4, %s1827_s24 }
 0x18e   :  { %v1033_v21 = vpop.permute.xlu1 %1032  ;;  %v878_v7 = vadd.f32 %v2244_v11, %v773_v59  ;;  %v925_v11 = vsel %vm891_vm5, %v922_v30, %v924_v24  ;;  %v1132_v30 = vsel %vm1100_vm4, %v1129_v12, %v1131_v60 }
 0x18f   :  { %v947_v29 = vpop.permute.xlu0 %946 }
 0x190   :  { %v1000_v62 = vadd.f32 %v947_v29, %v877_v35 }
 0x192   :  { %v1086_v46 = vadd.f32 %v1033_v21, %v1000_v62  ;;  %736 = vrot.lane.b32.xlu2 %v613_v57, %s1828_s27 }
 0x194   :  { %v1209_v22 = vadd.f32 %v2549_v53, %v1086_v46  ;;  %v2633_v19 = vpop.permute.xlu2 %1161  ;;  %1046 = vrot.lane.b32.xlu1 %v923_v61, %s1826_s23  ;;  %v489_v53 = vrot.slane %v2614_v55, 1  ;;  %v381_v61 = vpop.f32.mrf.mxu2 }
 0x195   :  { %964 = vrot.lane.b32.xlu0 %v925_v11, %s1827_s24 }
 0x196   :  { %v2640_v35 = vadd.f32 %v2568_v33, %v1209_v22  ;;  %v639_v45 = vpop.permute.xlu1 %638  ;;  %v490_v33 = vsel %vm454_vm2, %v487_v51, %v489_v53 }
 0x197   :  { %v514_v34 = vpop.permute.xlu0 %513 }
 0x198   :  { %v565_v4 = vadd.f32 %v514_v34, %v2163_v3  ;;  %v926_v3 = vrot.slane %v2397_v2, 4 }
 0x19a   :  { %v688_v59 = vadd.f32 %v637_v6, %v565_v4  ;;  %1171 = vrot.lane.b32.xlu2 %v1132_v30, %s1828_s27  ;;  %v927_v43 = vsel %vm891_vm5, %v924_v24, %v926_v3 }
 0x19c   :  { %v2649_v54 = vpop.permute.xlu2 %642  ;;  %1048 = vrot.lane.b32.xlu1 %v925_v11, %s1826_s23  ;;  %v774_v28 = vadd.f32 %v2562_v56, %v688_v59  ;;  %v383_v6 = vpop.f32.mrf.mxu2  ;;  %v1133_v11 = vrot.slane %v2397_v2, 5 }
 0x19d   :  { %529 = vrot.lane.b32.xlu0 %v490_v33, %s1827_s24  ;;  %v2662_v56 = vpop.f32.mrf.mxu0 }
 0x19e   :  { %v1035_v21 = vpop.permute.xlu1 %1034  ;;  %v879_v29 = vadd.f32 %v2249_v16, %v774_v28  ;;  %v491_v38 = vrot.slane %v2662_v56, 1 }
 0x19f   :  { %v949_v62 = vpop.permute.xlu0 %948 }
 0x1a0   :  { %v1001_v12 = vadd.f32 %v949_v62, %v878_v7  ;;  %v492_v62 = vsel %vm454_vm2, %v489_v53, %v491_v38 }
 0x1a2   :  { %v1087_v46 = vadd.f32 %v1035_v21, %v1001_v12  ;;  %1050 = vrot.lane.b32.xlu2 %v927_v43, %s1826_s23 }
 0x1a4   :  { %v1210_v22 = vadd.f32 %v2586_v52, %v1087_v46  ;;  %v727_v51 = vpop.permute.xlu2 %726  ;;  %1056 = vrot.lane.b32.xlu1 %v2204_v40, %s1826_s23  ;;  %v1134_v52 = vsel %vm1100_vm4, %v1131_v60, %v1133_v11  ;;  %v614_v60 = vrot.slane %v2662_v56, 2 }
 0x1a5   :  { %652 = vrot.lane.b32.xlu0 %v613_v57, %s1826_s23 }
 0x1a6   :  { %v2666_v16 = vadd.f32 %v2603_v10, %v1210_v22  ;;  %v1037_v7 = vpop.permute.xlu1 %1036  ;;  %v3245_v10 = vrot.slane %v1990_v31, 1  ;;  %v615_v53 = vsel %vm577_vm1, %v612_v1, %v614_v60 }
 0x1a7   :  { %v516_v24 = vpop.permute.xlu0 %515 }
 0x1a8   :  { %v566_v34 = vadd.f32 %v516_v24, %v2178_v15  ;;  %v494_v57 = vsel %vm454_vm2, %v491_v38, %v3245_v10  ;;  %v3249_v10 = vld [vmem:[#allocation2_spill] sm:$0xff] }
 0x1aa   :  { %v689_v40 = vadd.f32 %v639_v45, %v566_v34  ;;  %1173 = vrot.lane.b32.xlu2 %v1134_v52, %s1828_s27 }
 0x1ac   :  { %v729_v4 = vpop.permute.xlu2 %728  ;;  %1054 = vrot.lane.b32.xlu1 %v2230_v9, %s1826_s23  ;;  %v775_v61 = vadd.f32 %v2597_v26, %v689_v40  ;;  %v3246_v9 = vrot.slane %v1990_v31, 2  ;;  %v3247_v31 = vrot.slane %v2118_v42, 5 }
 0x1ad   :  { %533 = vrot.lane.b32.xlu0 %v494_v57, %s1827_s24 }
 0x1ae   :  { %v1039_v15 = vpop.permute.xlu1 %1038  ;;  %v880_v30 = vadd.f32 %v2322_v23, %v775_v61  ;;  %v617_v28 = vsel %vm577_vm1, %v614_v60, %v3246_v9  ;;  %v1141_v23 = vrot.slane %v2258_v8, 5  ;;  %v3250_v61 = vld [vmem:[#allocation6_spill] sm:$0xff] }
 0x1af   :  { %v951_v45 = vpop.permute.xlu0 %950 }
 0x1b0   :  { %v1002_v59 = vadd.f32 %v951_v45, %v879_v29  ;;  %v1142_v46 = vsel %vm1100_vm4, %v3247_v31, %v1141_v23 }
 0x1b2   :  { %v1088_v33 = vadd.f32 %v1037_v7, %v1002_v59  ;;  %1143 = vrot.lane.b32.xlu2 %v2052_v0, %s1828_s27 }
 0x1b4   :  { %v1211_v21 = vadd.f32 %v2616_v49, %v1088_v33  ;;  %v1164_v26 = vpop.permute.xlu2 %1163  ;;  %656 = vrot.lane.b32.xlu1 %v617_v28, %s1826_s23 }
 0x1b5   :  { %531 = vrot.lane.b32.xlu0 %v492_v62, %s1827_s24 }
 0x1b6   :  { %v518_v29 = vpop.permute.xlu1 %517  ;;  %v2695_v12 = vadd.f32 %v2622_v44, %v1211_v21  ;;  %v3248_v44 = vrot.slane %v2080_v14, 4 }
 0x1b7   :  { %v953_v0 = vpop.permute.xlu0 %952  ;;  %v567_v42 = vadd.f32 %v518_v29, %v2369_v63 }
 0x1b8   :  { %v1003_v6 = vadd.f32 %v953_v0, %v880_v30  ;;  %v929_v7 = vsel %vm891_vm5, %v926_v3, %v3248_v44 }
 0x1ba   :  { %v1089_v49 = vadd.f32 %v1039_v15, %v1003_v6  ;;  %1181 = vrot.lane.b32.xlu2 %v1142_v46, %s1828_s27 }
 0x1bc   :  { %v1212_v8 = vadd.f32 %v2633_v19, %v1089_v49  ;;  %v1166_v22 = vpop.permute.xlu2 %1165  ;;  %654 = vrot.lane.b32.xlu1 %v615_v53, %s1826_s23 }
 0x1bd   :  { %968 = vrot.lane.b32.xlu0 %v929_v7, %s1827_s24 }
 0x1be   :  { %v641_v24 = vpop.permute.xlu1 %640  ;;  %v2712_v38 = vadd.f32 %v2643_v13, %v1212_v8 }
 0x1bf   :  { %v690_v34 = vadd.f32 %v641_v24, %v567_v42  ;;  %v520_v52 = vpop.permute.xlu0 %519 }
 0x1c0   :  { %v568_v1 = vadd.f32 %v520_v52, %v2395_v47  ;;  %v2723_v47 = vpop.f32.mrf.mxu2 }
 0x1c1   :  { %v776_v19 = vadd.f32 %v727_v51, %v690_v34  ;;  %v3251_v51 = vld [vmem:[#allocation3_spill] sm:$0xff] }
 0x1c2   :  { %v691_v40 = vadd.f32 %v2649_v54, %v568_v1  ;;  %1179 = vrot.lane.b32.xlu2 %v3249_v10, %s1828_s27 }
 0x1c3   :  { %v881_v3 = vadd.f32 %v2388_v58, %v776_v19 }
 0x1c4   :  { %v649_v57 = vpop.permute.xlu2 %648  ;;  %740 = vrot.lane.b32.xlu1 %v617_v28, %s1828_s27  ;;  %v777_v63 = vadd.f32 %v729_v4, %v691_v40 }
 0x1c5   :  { %966 = vrot.lane.b32.xlu0 %v927_v43, %s1827_s24  ;;  %v3252_v43 = vrot.slane %v2080_v14, 5 }
 0x1c6   :  { %v645_v13 = vpop.permute.xlu1 %644  ;;  %v882_v15 = vadd.f32 %v3250_v61, %v777_v63 }
 0x1c7   :  { %v955_v30 = vpop.permute.xlu0 %954  ;;  %v1136_v33 = vsel %vm1100_vm4, %v1133_v11, %v3252_v43 }
 0x1c8   :  { %v1004_v60 = vadd.f32 %v955_v30, %v881_v3  ;;  %v2738_v28 = vpop.f32.mrf.mxu2 }
 0x1ca   :  { %738 = vrot.lane.b32.xlu2 %v615_v53, %s1828_s27 }
 0x1cc   :  { %v733_v54 = vpop.permute.xlu2 %732  ;;  %1177 = vrot.lane.b32.xlu1 %v3251_v51, %s1828_s27  ;;  %v2749_v51 = vpop.f32.mrf.mxu3 }
 0x1cd   :  { %1052 = vrot.lane.b32.xlu0 %v929_v7, %s1826_s23 }
 0x1ce   :  { %v1041_v58 = vpop.permute.xlu1 %1040 }
 0x1cf   :  { %v1090_v45 = vadd.f32 %v1041_v58, %v1004_v60  ;;  %v522_v4 = vpop.permute.xlu0 %521 }
 0x1d0   :  { %v569_v23 = vadd.f32 %v522_v4, %v2421_v41  ;;  %v2741_v6 = vpop.f32.mrf.mxu2 }
 0x1d1   :  { %v2728_v59 = vadd.f32 %v1164_v26, %v1090_v45 }
 0x1d2   :  { %1175 = vrot.lane.b32.xlu2 %v1136_v33, %s1828_s27  ;;  %v692_v0 = vadd.f32 %v645_v13, %v569_v23 }
 0x1d4   :  { %v2736_v9 = vpop.permute.xlu2 %1167 }
 0x1d6   :  { %v524_v21 = vpop.permute.xlu1 %523 }
 0x1d7   :  { %v957_v62 = vpop.permute.xlu0 %956  ;;  %v570_v10 = vadd.f32 %v524_v21, %v2462_v32 }
 0x1d8   :  { %v1005_v46 = vadd.f32 %v957_v62, %v882_v15  ;;  %v392_v44 = vpop.f32.mrf.mxu2 }
 0x1dc   :  { %v735_v29 = vpop.permute.xlu2 %734 }
 0x1de   :  { %v647_v26 = vpop.permute.xlu1 %646 }
 0x1df   :  { %v731_v14 = vpop.permute.xlu0 %730 }
 0x1e0   :  { %v778_v31 = vadd.f32 %v731_v14, %v692_v0  ;;  %v394_v34 = vpop.f32.mrf.mxu2 }
 0x1e2   :  { %v883_v2 = vadd.f32 %v2438_v50, %v778_v31  ;;  %v693_v50 = vadd.f32 %v647_v26, %v570_v10 }
 0x1e4   :  { %v1170_v11 = vpop.permute.xlu2 %1169 }
 0x1e6   :  { %v1043_v49 = vpop.permute.xlu1 %1042 }
 0x1e7   :  { %v959_v53 = vpop.permute.xlu0 %958  ;;  %v1091_v8 = vadd.f32 %v1043_v49, %v1005_v46  ;;  %v1272_v46 = vrot.slane %v392_v44, 6  ;;  %v1274_v49 = vrot.slane %v394_v34, 6  ;;  %v1267_v44 = vrot.slane %v2723_v47, 6 }
 0x1e8   :  { %v397_v40 = vpop.f32.mrf.mxu2 }
 0x1e9   :  { %v2744_v7 = vadd.f32 %v1166_v22, %v1091_v8  ;;  %v779_v22 = vadd.f32 %v733_v54, %v693_v50  ;;  %v1006_v54 = vadd.f32 %v959_v53, %v883_v2  ;;  %v1276_v0 = vrot.slane %v397_v40, 6  ;;  %v2762_v53 = vpop.f32.mrf.mxu3  ;;  %v3254_v40 = vld [vmem:[#allocation13_spill] sm:$0xff] }
 0x1ea   :  { %v1270_v2 = vrot.slane %v2741_v6, 6  ;;  %v1268_v6 = vrot.slane %v2738_v28, 6 }
 0x1eb   :  { %v884_v43 = vadd.f32 %v2443_v37, %v779_v22 }
 0x1ec   :  { %v737_v42 = vpop.permute.xlu2 %736  ;;  %v1273_v50 = vsel %vm1245_vm6, %v1270_v2, %v1272_v46  ;;  %v1271_v47 = vsel %vm1245_vm6, %v1268_v6, %v1270_v2 }
 0x1ed   :  { %v1319_v28 = vadd.f32 %v1271_v47, %v2744_v7 }
 0x1ee   :  { %v1045_v24 = vpop.permute.xlu1 %1044 }
 0x1ef   :  { %v526_v41 = vpop.permute.xlu0 %525  ;;  %v1092_v14 = vadd.f32 %v1045_v24, %v1006_v54 }
 0x1f0   :  { %v571_v13 = vadd.f32 %v526_v41, %v2496_v20  ;;  %v2751_v4 = vpop.f32.mrf.mxu2  ;;  %v3253_v41 = vld [vmem:[#allocation8_spill] sm:$0xff] }
 0x1f1   :  { %v1278_v23 = vrot.slane %v2751_v4, 6  ;;  %v1215_v34 = vadd.f32 %v2736_v9, %v1092_v14  ;;  %v1277_v9 = vsel %vm1245_vm6, %v1274_v49, %v1276_v0  ;;  %v1421_v4 = vld [vmem:[%s3196_s5 + $0x18] sm:$0xff] }
 0x1f2   :  { %v694_v60 = vadd.f32 %v649_v57, %v571_v13 }
 0x1f3   :  { %v1279_v37 = vsel %vm1245_vm6, %v1276_v0, %v1278_v23  ;;  %v1370_v0 = vld [vmem:[%s3195_s2] sm:$0xf] }
 0x1f4   :  { %v1172_v52 = vpop.permute.xlu2 %1171  ;;  %v780_v62 = vadd.f32 %v735_v29, %v694_v60  ;;  %1372 = vst [vmem:[#allocation1] ss:$4 sm:$0xff] %v1370_v0  ;;  %v1282_v0 = vrot.slane %v2762_v53, 6 }
 0x1f6   :  { %v651_v1 = vpop.permute.xlu1 %650  ;;  %v885_v31 = vadd.f32 %v2515_v36, %v780_v62  ;;  %v2767_v36 = vld [vmem:[%s3194_s4] ss:$0 sm:$0xff] }
 0x1f7   :  { %v961_v19 = vpop.permute.xlu0 %960 }
 0x1f8   :  { %v1007_v21 = vadd.f32 %v961_v19, %v884_v43 }
 0x1fc   :  { %v1051_v3 = vpop.permute.xlu2 %1050 }
 0x1fe   :  { %v963_v63 = vpop.permute.xlu1 %962 }
 0x1ff   :  { %v528_v61 = vpop.permute.xlu0 %527  ;;  %v1008_v29 = vadd.f32 %v963_v63, %v885_v31  ;;  %v1275_v63 = vsel %vm1245_vm6, %v1272_v46, %v1274_v49  ;;  %v2833_v46 = vadd.f32 %v2767_v36, %v2695_v12  ;;  %v2847_v12 = vadd.f32 %v2767_v36, %v2640_v35 }
 0x200   :  { %v572_v15 = vadd.f32 %v528_v61, %v2527_v39 }
 0x201   :  { %v1356_v35 = vmax.f32 %v2847_v12, 0.0 }
 0x202   :  { %v695_v30 = vadd.f32 %v651_v1, %v572_v15 }
 0x204   :  { %v1174_v58 = vpop.permute.xlu2 %1173  ;;  %v781_v45 = vadd.f32 %v737_v42, %v695_v30  ;;  %v1320_v30 = vadd.f32 %v1273_v50, %v1215_v34  ;;  %v3256_v50 = vld [vmem:[#allocation11_spill] sm:$0xff] }
 0x206   :  { %v1047_v32 = vpop.permute.xlu1 %1046  ;;  %v886_v33 = vadd.f32 %v2518_v5, %v781_v45  ;;  %v2800_v62 = vadd.f32 %v2767_v36, %v1320_v30 }
 0x207   :  { %v965_v20 = vpop.permute.xlu0 %964  ;;  %v1093_v57 = vadd.f32 %v1047_v32, %v1007_v21 }
 0x208   :  { %v1009_v39 = vadd.f32 %v965_v20, %v886_v33  ;;  %v2802_v20 = vpop.f32.mrf.mxu3 }
 0x209   :  { %v1216_v42 = vadd.f32 %v1170_v11, %v1093_v57 }
 0x20a   :  { %v1095_v26 = vadd.f32 %v1051_v3, %v1009_v39  ;;  %v2808_v39 = vadd.f32 %v2767_v36, %v1319_v28 }
 0x20b   :  { %v1321_v61 = vadd.f32 %v1275_v63, %v1216_v42  ;;  %v2851_v42 = vadd.f32 %v2767_v36, %v2606_v17  ;;  %v2863_v17 = vadd.f32 %v2767_v36, %v2576_v25  ;;  %v2873_v63 = vadd.f32 %v2767_v36, %v3256_v50  ;;  %v3258_v25 = vld [vmem:[#allocation10_spill] sm:$0xff]  ;;  %v1373_v50 = vld.sshfl [vmem:[#allocation1] sm:$0xff pattern:$0x73625140] }
 0x20c   :  { %v1218_v5 = vadd.f32 %v1174_v58, %v1095_v26  ;;  %v1144_v8 = vpop.permute.xlu2 %1143  ;;  %v1269_v58 = vsel %vm1245_vm6, %v1267_v44, %v1268_v6  ;;  %v3221_v57 = vmax.f32 %v2808_v39, 0.0  ;;  %v2824_v26 = vadd.f32 %v2767_v36, %v2712_v38 }
 0x20d   :  { %v1203_v1 = vadd.f32 %v1144_v8, %v3253_v41  ;;  %v1318_v32 = vadd.f32 %v1269_v58, %v2728_v59  ;;  %v3220_v59 = vmax.f32 %v2800_v62, 0.0  ;;  %v2840_v38 = vadd.f32 %v2767_v36, %v2666_v16 }
 0x20e   :  { %v1323_v19 = vadd.f32 %v1279_v37, %v1218_v5  ;;  %v1049_v24 = vpop.permute.xlu1 %1048  ;;  %v3223_v5 = vmax.f32 %v2824_v26, 0.0  ;;  %v1284_v41 = vrot.slane %v2802_v20, 6  ;;  %v1355_v6 = vmax.f32 %v2851_v42, 0.0 }
 0x20f   :  { %v2772_v10 = vadd.f32 %v3254_v40, %v1203_v1  ;;  %v1094_v11 = vadd.f32 %v1049_v24, %v1008_v29  ;;  %v2774_v3 = vpop.permute.xlu0 %529  ;;  %v2814_v54 = vadd.f32 %v2767_v36, %v1318_v32  ;;  %v3224_v29 = vmax.f32 %v2833_v46, 0.0  ;;  %v3255_v40 = vld [vmem:[#allocation5_spill] sm:$0xff] }
 0x210   :  { %v2780_v13 = vadd.f32 %v2767_v36, %v1323_v19  ;;  %v409_v8 = vpop.f32.mrf.mxu3  ;;  %v1357_v2 = vmax.f32 %v2840_v38, 0.0  ;;  %v1353_v28 = vmax.f32 %v2873_v63, 0.0  ;;  %v3260_v32 = vld [vmem:[#allocation9_spill] sm:$0xff]  ;;  %v3263_v12 = vmax.f32 %v2824_v26, 0.0 }
 0x211   :  { %v1217_v15 = vadd.f32 %v1172_v52, %v1094_v11  ;;  %v2793_v52 = vadd.f32 %v2767_v36, %v1321_v61  ;;  %v3222_v37 = vmax.f32 %v2814_v54, 0.0  ;;  %v1286_v1 = vrot.slane %v409_v8, 6 }
 0x212   :  { %v3217_v22 = vmax.f32 %v2780_v13, 0.0  ;;  %v2889_v20 = vadd.f32 %v2767_v36, %v3260_v32 }
 0x213   :  { %v1322_v60 = vadd.f32 %v1277_v9, %v1217_v15  ;;  %v3219_v7 = vmax.f32 %v2793_v52, 0.0  ;;  %v3257_v15 = vld [vmem:[#allocation4_spill] sm:$0xff]  ;;  %v2881_v9 = vadd.f32 %v2767_v36, %v3258_v25 }
 0x214   :  { %1378 = vmatpush.msrb.mxu3 %v3217_v22  ;;  %v1182_v49 = vpop.permute.xlu2 %1181  ;;  %v1351_v53 = vmax.f32 %v2889_v20, 0.0 }
 0x215   :  { %v2790_v45 = vadd.f32 %v2767_v36, %v1322_v60  ;;  %v1222_v34 = vadd.f32 %v1182_v49, %v2557_v27  ;;  %v1354_v27 = vmax.f32 %v2863_v17, 0.0  ;;  %v3259_v60 = vld [vmem:[#allocation12_spill] sm:$0xff] }
 0x216   :  { %v1057_v43 = vpop.permute.xlu1 %1056 }
 0x217   :  { %v2796_v33 = vpop.permute.xlu0 %652  ;;  %v3218_v21 = vmax.f32 %v2790_v45, 0.0 }
 0x219   :  { %1379 = vmatpush.msrb.mxu3 %v3218_v21 }
 0x21b   :  { %1380 = vmatpush.msrb.mxu3 %v3219_v7 }
 0x21c   :  { %v1180_v61 = vpop.permute.xlu2 %1179 }
 0x21d   :  { %1381 = vmatpush.msrb.mxu3 %v3220_v59 }
 0x21e   :  { %v2826_v14 = vpop.permute.xlu1 %1054 }
 0x21f   :  { %v534_v31 = vpop.permute.xlu0 %533  ;;  %1382 = vmatpush.msrb.mxu3 %v3221_v57 }
 0x220   :  { %v575_v16 = vadd.f32 %v534_v31, %v2662_v56  ;;  %v1287_v56 = vsel %vm1245_vm6, %v1284_v41, %v1286_v1  ;;  %v1352_v1 = vmax.f32 %v2881_v9, 0.0 }
 0x221   :  { %1383 = vmatpush.msrb.mxu3 %v3222_v37  ;;  %v1327_v30 = vadd.f32 %v1287_v56, %v1222_v34 }
 0x223   :  { %1384 = vmatpush.msrb.mxu3 %v3223_v5 }
 0x225   :  { %1385 = vmatpush.msrb.mxu3 %v3224_v29 }
 0x226   :  { %v657_v19 = vpop.permute.xlu1 %656 }
 0x227   :  { %v698_v24 = vadd.f32 %v657_v19, %v575_v16  ;;  %v532_v44 = vpop.permute.xlu0 %531  ;;  %1386 = vmatpush.msrb.mxu3 %v1357_v2  ;;  %v2897_v16 = vadd.f32 %v2767_v36, %v2772_v10  ;;  %v2900_v19 = vadd.f32 %v2767_v36, %v1327_v30  ;;  %v3261_v30 = vld [vmem:[#allocation7_spill] sm:$0xff] }
 0x228   :  { %v574_v34 = vadd.f32 %v532_v44, %v2614_v55 }
 0x229   :  { %v784_v11 = vadd.f32 %v3255_v40, %v698_v24  ;;  %1387 = vmatpush.msrb.mxu3 %v1356_v35  ;;  %v1350_v56 = vmax.f32 %v2897_v16, 0.0  ;;  %v573_v40 = vadd.f32 %v2774_v3, %v2584_v48 }
 0x22b   :  { %v889_v47 = vadd.f32 %v3257_v15, %v784_v11  ;;  %1388 = vmatpush.msrb.mxu3 %v1355_v6  ;;  %v3213_v11 = vmax.f32 %v2900_v19, 0.0  ;;  %v739_v15 = vpop.permute.xlu2 %738  ;;  %v696_v55 = vadd.f32 %v2796_v33, %v573_v40 }
 0x22d   :  { %v1012_v58 = vadd.f32 %v3259_v60, %v889_v47  ;;  %1389 = vmatpush.msrb.mxu3 %v1354_v27  ;;  %v782_v3 = vadd.f32 %v739_v15, %v696_v55 }
 0x22e   :  { %v655_v31 = vpop.permute.xlu1 %654 }
 0x22f   :  { %v1098_v49 = vadd.f32 %v1057_v43, %v1012_v58  ;;  %v969_v8 = vpop.permute.xlu0 %968  ;;  %1390 = vmatpush.msrb.mxu3 %v1353_v28  ;;  %v1285_v43 = vsel %vm1245_vm6, %v1282_v0, %v1284_v41  ;;  %v697_v47 = vadd.f32 %v655_v31, %v574_v34  ;;  %v887_v32 = vadd.f32 %v2573_v18, %v782_v3 }
 0x230   :  { %v1280_v31 = vrot.slane %v2749_v51, 6 }
 0x231   :  { %1391 = vmatpush.msrb.mxu3 %v1352_v1  ;;  %v1221_v24 = vadd.f32 %v1180_v61, %v1098_v49 }
 0x233   :  { %1392 = vmatpush.msrb.mxu3 %v1351_v53  ;;  %v1326_v10 = vadd.f32 %v1285_v43, %v1221_v24 }
 0x235   :  { %1393 = vmatpush.msrb.mxu3 %v1350_v56  ;;  %v2916_v41 = vadd.f32 %v2767_v36, %v1326_v10  ;;  %v1283_v10 = vsel %vm1245_vm6, %v1280_v31, %v1282_v0 }
 0x236   :  { %v741_v44 = vpop.permute.xlu1 %740  ;;  %1394 = vmatmul.f32.vlgmr.msrb.gmra.mxu3 %v1373_v50  ;;  %v1176_v50 = vpop.permute.xlu2 %1175 }
 0x237   :  { %1410 = vmatpush.msra.mxu3 %v3213_v11  ;;  %v783_v61 = vadd.f32 %v741_v44, %v697_v47  ;;  %v967_v25 = vpop.permute.xlu0 %966  ;;  %v3214_v48 = vmax.f32 %v2916_v41, 0.0  ;;  %v1374_v44 = vld.sshfl [vmem:[#allocation1 + $0x8] sm:$0xff pattern:$0x73625140] }
 0x238   :  { %v1010_v49 = vadd.f32 %v967_v25, %v887_v32  ;;  %v1447_v25 = vld [vmem:[%s3197_s6] sm:$0x3] }
 0x239   :  { %v888_v60 = vadd.f32 %v3261_v30, %v783_v61  ;;  %1411 = vmatpush.msra.mxu3 %v3214_v48  ;;  %v1418_v61 = vld [vmem:[%s3196_s5] sm:$0xff] }
 0x23b   :  { %v1011_v58 = vadd.f32 %v969_v8, %v888_v60  ;;  %v1281_v8 = vsel %vm1245_vm6, %v1278_v23, %v1280_v31  ;;  %v1420_v23 = vld [vmem:[%s3196_s5 + $0x10] sm:$0xff] }
 0x23d   :  { %v1097_v33 = vadd.f32 %v2826_v14, %v1011_v58  ;;  %v1422_v58 = vld [vmem:[%s3198_s1] sm:$0x3] }
 0x23e   :  { %v1178_v24 = vpop.permute.xlu1 %1177 }
 0x23f   :  { %v1220_v43 = vadd.f32 %v1178_v24, %v1097_v33  ;;  %v1053_v34 = vpop.permute.xlu0 %1052 }
 0x240   :  { %v1096_v40 = vadd.f32 %v1053_v34, %v1010_v49  ;;  %v1821_v49 = vld [vmem:[%s3194_s4 + $0x1] ss:$0 sm:$0xff] }
 0x241   :  { %v1325_v15 = vadd.f32 %v1283_v10, %v1220_v43 }
 0x242   :  { %v1219_v47 = vadd.f32 %v1176_v50, %v1096_v40 }
 0x243   :  { %v2933_v18 = vadd.f32 %v2767_v36, %v1325_v15  ;;  %v28_v15 = vld [vmem:[%s3193_s0 + $0x4] sm:$0xff]  }
 0x244   :  { %v1324_v14 = vadd.f32 %v1281_v8, %v1219_v47  ;;  %v30_v47 = vld [vmem:[%s3193_s0 + $0xc] sm:$0xff]   ;;  %v32_v8 = vld [vmem:[%s3193_s0 + $0x14] sm:$0xff]  }
 0x245   :  { %v3215_v51 = vmax.f32 %v2933_v18, 0.0 }
 0x246   :  { %v2937_v55 = vadd.f32 %v2767_v36, %v1324_v14  ;;  %v1419_v36 = vld [vmem:[%s3196_s5 + $0x8] sm:$0xff] }
 0x247   :  { %1412 = vmatpush.msra.mxu3 %v3215_v51 }
 0x248   :  { %v3216_v0 = vmax.f32 %v2937_v55, 0.0 }
 0x24a   :  { %1413 = vmatpush.msra.mxu3 %v3216_v0 }
 0x24b   :  { %1787 = vmatmul.msk.f32.vlgmr.msra.gmra.mxu3 %vm158_vm0, %v1374_v44  ;;  %v34_v44 = vld [vmem:[%s3193_s0 + $0x1c] sm:$0xff]  }
 0x24c   :  { %1438 = vmatpush.msrb.mxu3 %v1421_v4  ;;  %v2983_v4 = vld [vmem:[%s3193_s0 + $0x24] sm:$0xff]  }
 0x24e   :  { %1439 = vmatpush.msrb.mxu3 %v1420_v23  ;;  %v2988_v23 = vld [vmem:[%s3193_s0 + $0x2c] sm:$0xf] }
 0x250   :  { %1440 = vmatpush.msrb.mxu3 %v1419_v36 }
 0x252   :  { %1441 = vmatpush.msrb.mxu3 %v1418_v61  ;;  %v1496_v61 = vunpack.c.l.bf16 %v28_v15 }
 0x254   :  { %1789 = vmatpush.msk.msra.mxu3 %vm1245_vm6, %v1447_v25  ;;  %v1497_v25 = vunpack.c.h.bf16 %v28_v15  ;;  %v1504_v15 = vunpack.c.l.bf16 %v2983_v4 }
 0x256   :  { %v1581_v9 = vrot.slane %v1504_v15, 3  ;;  %v3262_v15 = vmax.f32 %v2833_v46, 0.0  ;;  %v3264_v46 = vmax.f32 %v2814_v54, 0.0  ;;  %v3266_v54 = vmax.f32 %v2800_v62, 0.0 }
 0x257   :  { %v3268_v62 = vmax.f32 %v2790_v45, 0.0 }
 0x2b9   :  { %v1395_v3 = vpop.f32.mrf.mxu3 }
 0x2ce   :  { %v1415_v30 = vpop.f32.mrf.mxu3 }
 0x2cf   :  { %v1416_v60 = vadd.f32 %v1415_v30, %v1395_v3  ;;  %v1498_v3 = vunpack.c.l.bf16 %v30_v47  ;;  %v2993_v30 = vld [vmem:[%s3193_s0 + $0x38] sm:$0xff]  }
 0x2d0   :  { %v1507_v48 = vunpack.c.l.bf16 %v2993_v30 }
 0x2d1   :  { %1788 = vmatmul.msk.f32.vlgmr.msrb.gmra.mxu3 %vm158_vm0, %v1416_v60  ;;  %v1569_v7 = vrot.slane %v1498_v3, 3 }
 0x354   :  { %v1443_v32 = vpop.f32.mrf.mxu3 }
 0x355   :  { %v1444_v33 = vadd.f32 %v1443_v32, %v1422_v58  ;;  %v1499_v58 = vunpack.c.h.bf16 %v30_v47  ;;  %v1500_v32 = vunpack.c.l.bf16 %v32_v8  ;;  %v1505_v47 = vunpack.c.h.bf16 %v2983_v4 }
 0x357   :  { %v1446_v31 = vmax.f32 %v1444_v33, 0.0  ;;  %v1501_v33 = vunpack.c.h.bf16 %v32_v8  ;;  %v1506_v8 = vunpack.c.l.bf16 %v2988_v23  ;;  %v3021_v23 = vld [vmem:[%s3193_s0 + $0x58] sm:$0xff]   ;;  %v1571_v57 = vrot.slane %v1499_v58, 3 }
 0x358   :  { %v1573_v37 = vrot.slane %v1500_v32, 3 }
 0x359   :  { %1790 = vmatmul.msk.f32.vlgmr.msra.gmra.mxu3 %vm1450_vm7, %v1446_v31  ;;  %v2998_v31 = vld [vmem:[%s3193_s0 + $0x40] sm:$0xff]   ;;  %v1575_v5 = vrot.slane %v1501_v33, 3 }
 0x35a   :  { %v1510_v0 = vunpack.c.h.bf16 %v2998_v31 }
 0x3dc   :  { %v1474_v24 = vpop.f32.mrf.mxu3 }
 0x3dd   :  { %v1475_v43 = vadd.f32 %v1821_v49, %v1474_v24  ;;  %v3003_v49 = vld [vmem:[%s3193_s0 + $0x48] sm:$0xff]  }
 0x3de   :  { %v1511_v4 = vunpack.c.l.bf16 %v3003_v49  ;;  %v1512_v21 = vunpack.c.h.bf16 %v3003_v49 }
 0x3df   :  { %v1791_v34 = vmul.f32 -1.442695, %v1475_v43 }
 0x3e1   :  { %1822 = vpow2.f32 %v1791_v34  ;;  %v1502_v34 = vunpack.c.l.bf16 %v34_v44 }
 0x3e7   :  { %v1823_v10 = vpop.eup %1822 }
 0x3e8   :  { %v1480_v40 = vadd.f32 1.0, %v1823_v10  ;;  %v1503_v10 = vunpack.c.h.bf16 %v34_v44  ;;  %v1509_v44 = vunpack.c.l.bf16 %v2998_v31 }
 0x3ea   :  { %1824 = vrcp.f32 %v1480_v40  ;;  %v1492_v60 = vand.u32 2147483648, %v1480_v40  ;;  %v1490_v43 = vand.u32 2147483647, %v1480_v40  ;;  %vm1486_vm9 = vweird.f32 %v1480_v40 }
 0x3ec   :  { %v1493_v51 = vor.u32 1.1754944e-38, %v1492_v60  ;;  %vm1491_vm11 = vcmp.eq.f32.partialorder %v1490_v43, 8.507059e+37  ;;  %v1516_v43 = vunpack.c.h.bf16 %v3021_v23 }
 0x3ee   :  { %v1604_v45 = vrot.slane %v1516_v43, 3 }
 0x3f0   :  { %v1825_v50 = vpop.eup %1824 }
 0x3f1   :  { %v1482_v14 = vmul.f32 %v1825_v50, %v1480_v40  ;;  %vm1487_vm8 = vweird.f32 %v1825_v50  ;;  %v1566_v40 = vrot.slane %v1496_v61, 3  ;;  %v1577_v61 = vrot.slane %v1502_v34, 3 }
 0x3f2   :  { %vm1488_vm10 = vmor %vm1486_vm9, %vm1487_vm8  ;;  %v1572_v34 = vsel %vm808_vm3, %v1569_v7, %v1571_v57 }
 0x3f3   :  { %v1483_v36 = vsub.f32 1.0, %v1482_v14  ;;  %v3011_v14 = vld [vmem:[%s3193_s0 + $0x50] sm:$0xff]   ;;  %v1578_v20 = vsel %vm808_vm3, %v1575_v5, %v1577_v61 }
 0x3f4   :  { %v1513_v31 = vunpack.c.l.bf16 %v3011_v14 }
 0x3f5   :  { %v1484_v24 = vmul.f32 %v1825_v50, %v1483_v36  ;;  %v1508_v36 = vunpack.c.h.bf16 %v2993_v30  ;;  %v3026_v30 = vld [vmem:[%s3193_s0 + $0x60] sm:$0xf] }
 0x3f6   :  { %v1517_v29 = vunpack.c.l.bf16 %v3026_v30 }
 0x3f7   :  { %v1485_v11 = vadd.f32 %v1825_v50, %v1484_v24  ;;  %v1567_v24 = vrot.slane %v1497_v25, 3  ;;  %v1579_v25 = vrot.slane %v1503_v10, 3  ;;  %v1574_v10 = vsel %vm808_vm3, %v1571_v57, %v1573_v37 }
 0x3f9   :  { %v1489_v22 = vsel %vm1488_vm10, %v1825_v50, %v1485_v11  ;;  %v1514_v11 = vunpack.c.h.bf16 %v3011_v14  ;;  %v1515_v50 = vunpack.c.l.bf16 %v3021_v23  ;;  %v1570_v33 = vsel %vm808_vm3, %v1567_v24, %v1569_v7 }
 0x3fa   :  { %v1494_v60 = vsel %vm1491_vm11, %v1493_v51, %v1489_v22  ;;  %v1568_v51 = vsel %vm808_vm3, %v1566_v40, %v1567_v24  ;;  %v1576_v14 = vsel %vm808_vm3, %v1573_v37, %v1575_v5  ;;  %v1587_v5 = vrot.slane %v1507_v48, 3 }
 0x3fb   :  { %v1520_v59 = vperm.slane %v1494_v60, 0  ;;  %v1519_v22 = vrot.slane %v1494_v60, 1  ;;  %v1582_v42 = vsel %vm808_vm3, %v1579_v25, %v1581_v9  ;;  %v3271_v23 = vmax.f32 %v2933_v18, 0.0 }
 0x3fc   :  { %v3273_v18 = vmax.f32 %v2900_v19, 0.0 }
 0x3fd   :  { %v1524_v3 = vmul.f32 %v1520_v59, %v1350_v56  ;;  %v1525_v58 = vmul.f32 %v1520_v59, %v1351_v53  ;;  %v1526_v32 = vmul.f32 %v1520_v59, %v1352_v1  ;;  %v1527_v49 = vmul.f32 %v1520_v59, %v1353_v28 }
 0x3fe   :  { %v1528_v16 = vmul.f32 %v1520_v59, %v1354_v27  ;;  %v1580_v53 = vsel %vm808_vm3, %v1577_v61, %v1579_v25  ;;  %v3051_v1 = vperm.slane %v1519_v22, 0  ;;  %v1529_v63 = vmul.f32 %v1520_v59, %v1355_v6 }
 0x3ff   :  { %v1583_v28 = vrot.slane %v1505_v47, 3  ;;  %v1585_v56 = vrot.slane %v1506_v8, 3  ;;  %v1530_v7 = vmul.f32 %v1520_v59, %v1356_v35  ;;  %v1628_v57 = vadd.f32 %v1568_v51, %v1524_v3 }
 0x400   :  { %v1629_v37 = vadd.f32 %v1570_v33, %v1525_v58  ;;  %v1630_v40 = vadd.f32 %v1572_v34, %v1526_v32  ;;  %v1531_v17 = vmul.f32 %v1520_v59, %v1357_v2  ;;  %v1588_v27 = vrot.slane %v1508_v36, 3 }
 0x401   :  { %v1631_v24 = vadd.f32 %v1574_v10, %v1527_v49  ;;  %v1532_v60 = vmul.f32 %v1520_v59, %v3262_v15  ;;  %v1590_v6 = vrot.slane %v1509_v44, 3  ;;  %v1632_v47 = vadd.f32 %v1576_v14, %v1528_v16  ;;  %1648 = vst.msk [vmem:[%s3199_s7] sm:$0xff] %vm158_vm0, %v1628_v57 }
 0x402   :  { %v1533_v35 = vmul.f32 %v1520_v59, %v3263_v12  ;;  %v1584_v38 = vsel %vm808_vm3, %v1581_v9, %v1583_v28  ;;  %v1592_v2 = vrot.slane %v1510_v0, 3  ;;  %v1633_v48 = vadd.f32 %v1578_v20, %v1529_v63  ;;  %1649 = vst.msk [vmem:[%s3199_s7 + $0x8] sm:$0xff] %vm158_vm0, %v1629_v37 }
 0x403   :  { %v1534_v8 = vmul.f32 %v3051_v1, %v3264_v46  ;;  %v1586_v36 = vsel %vm808_vm3, %v1583_v28, %v1585_v56  ;;  %v1594_v44 = vrot.slane %v1511_v4, 3  ;;  %v1634_v61 = vadd.f32 %v1580_v53, %v1530_v7  ;;  %1650 = vst.msk [vmem:[%s3199_s7 + $0x10] sm:$0xff] %vm158_vm0, %v1630_v40 }
 0x404   :  { %v3265_v59 = vmax.f32 %v2808_v39, 0.0  ;;  %v1589_v0 = vsel %vm808_vm3, %v1587_v5, %v1588_v27  ;;  %v1596_v25 = vrot.slane %v1512_v21, 3  ;;  %v1635_v22 = vadd.f32 %v1582_v42, %v1531_v17  ;;  %1651 = vst.msk [vmem:[%s3199_s7 + $0x18] sm:$0xff] %vm158_vm0, %v1631_v24 }
 0x405   :  { %v1536_v4 = vmul.f32 %v3051_v1, %v3266_v54  ;;  %v1591_v51 = vsel %vm808_vm3, %v1588_v27, %v1590_v6  ;;  %v1598_v3 = vrot.slane %v1513_v31, 3  ;;  %v1636_v58 = vadd.f32 %v1584_v38, %v1532_v60  ;;  %1652 = vst.msk [vmem:[%s3199_s7 + $0x20] sm:$0xff] %vm158_vm0, %v1632_v47 }
 0x406   :  { %v1535_v26 = vmul.f32 %v3051_v1, %v3265_v59  ;;  %v3267_v21 = vmax.f32 %v2793_v52, 0.0  ;;  %v1593_v32 = vsel %vm808_vm3, %v1590_v6, %v1592_v2  ;;  %v1600_v33 = vrot.slane %v1514_v11, 3  ;;  %1653 = vst.msk [vmem:[%s3199_s7 + $0x28] sm:$0xff] %vm158_vm0, %v1633_v48 }
 0x407   :  { %v1637_v49 = vadd.f32 %v1586_v36, %v1533_v35  ;;  %v1538_v31 = vmul.f32 %v3051_v1, %v3268_v62  ;;  %v1595_v34 = vsel %vm808_vm3, %v1592_v2, %v1594_v44  ;;  %v1602_v52 = vrot.slane %v1515_v50, 3  ;;  %1654 = vst.msk [vmem:[%s3199_s7 + $0x30] sm:$0xff] %vm158_vm0, %v1634_v61 }
 0x408   :  { %v1537_v39 = vmul.f32 %v3051_v1, %v3267_v21  ;;  %v1638_v10 = vadd.f32 %v1589_v0, %v1534_v8  ;;  %v3269_v11 = vmax.f32 %v2780_v13, 0.0  ;;  %v1597_v16 = vsel %vm808_vm3, %v1594_v44, %v1596_v25  ;;  %1655 = vst.msk [vmem:[%s3199_s7 + $0x38] sm:$0xff] %vm158_vm0, %v1635_v22 }
 0x409   :  { %v1639_v20 = vadd.f32 %v1591_v51, %v1535_v26  ;;  %v3270_v50 = vmax.f32 %v2937_v55, 0.0  ;;  %v1599_v9 = vsel %vm808_vm3, %v1596_v25, %v1598_v3  ;;  %v1606_v13 = vrot.slane %v1517_v29, 3  ;;  %1656 = vst.msk [vmem:[%s3199_s7 + $0x40] sm:$0xff] %vm158_vm0, %v1636_v58 }
 0x40a   :  { %v1539_v14 = vmul.f32 %v3051_v1, %v3269_v11  ;;  %v1640_v63 = vadd.f32 %v1593_v32, %v1536_v4  ;;  %v1541_v43 = vmul.f32 %v3051_v1, %v3271_v23  ;;  %v1601_v28 = vsel %vm808_vm3, %v1598_v3, %v1600_v33  ;;  %1657 = vst.msk [vmem:[%s3199_s7 + $0x48] sm:$0xff] %vm158_vm0, %v1637_v49 }
 0x40b   :  { %v1540_v53 = vmul.f32 %v3051_v1, %v3270_v50  ;;  %v1641_v55 = vadd.f32 %v1595_v34, %v1537_v39  ;;  %v3272_v29 = vmax.f32 %v2916_v41, 0.0  ;;  %v1603_v56 = vsel %vm808_vm3, %v1600_v33, %v1602_v52  ;;  %1658 = vst.msk [vmem:[%s3199_s7 + $0x50] sm:$0xff] %vm158_vm0, %v1638_v10 }
 0x40c   :  { %v1642_v7 = vadd.f32 %v1597_v16, %v1538_v31  ;;  %v1543_v57 = vmul.f32 %v3051_v1, %v3273_v18  ;;  %v1605_v37 = vsel %vm808_vm3, %v1602_v52, %v1604_v45  ;;  %v1643_v40 = vadd.f32 %v1599_v9, %v1539_v14  ;;  %1659 = vst.msk [vmem:[%s3199_s7 + $0x58] sm:$0xff] %vm158_vm0, %v1639_v20 }
 0x40d   :  { %v1542_v30 = vmul.f32 %v3051_v1, %v3272_v29  ;;  %v1607_v41 = vsel %vm808_vm3, %v1604_v45, %v1606_v13  ;;  %v1644_v17 = vadd.f32 %v1601_v28, %v1540_v53  ;;  %1660 = vst.msk [vmem:[%s3199_s7 + $0x60] sm:$0xff] %vm158_vm0, %v1640_v63  ;;  %v1645_v5 = vadd.f32 %v1603_v56, %v1541_v43 }
 0x40e   :  { %1661 = vst.msk [vmem:[%s3199_s7 + $0x68] sm:$0xff] %vm158_vm0, %v1641_v55  ;;  %v1647_v1 = vadd.f32 %v1607_v41, %v1543_v57 }
 0x40f   :  { %v1646_v19 = vadd.f32 %v1605_v37, %v1542_v30  ;;  %1662 = vst.msk [vmem:[%s3199_s7 + $0x70] sm:$0xff] %vm158_vm0, %v1642_v7 }
 0x410   :  { %1663 = vst.msk [vmem:[%s3199_s7 + $0x78] sm:$0xff] %vm158_vm0, %v1643_v40 }
 0x411   :  { %1664 = vst.msk [vmem:[%s3199_s7 + $0x80] sm:$0xff] %vm158_vm0, %v1644_v17 }
 0x412   :  { %1665 = vst.msk [vmem:[%s3199_s7 + $0x88] sm:$0xff] %vm158_vm0, %v1645_v5 }
 0x413   :  { %1666 = vst.msk [vmem:[%s3199_s7 + $0x90] sm:$0xff] %vm158_vm0, %v1646_v19 }
 0x414   :  { %1667 = vst.msk [vmem:[%s3199_s7 + $0x98] sm:$0xff] %vm158_vm0, %v1647_v1 }

</bundles_post_ra>
